<compile_context>
chip_gen: v7x
topology: tpu7x:2x2x1
jax: 0.10.0
libtpu: 0.0.40
codegen_flags: <defaults>
</compile_context>

<pallas_src>
import functools

import jax
import jax.numpy as jnp
from jax import lax
from jax.experimental import pallas as pl
from jax.experimental.pallas import tpu as pltpu

# Synthetic stand-ins for config.model.*
N_HEADS = 4
FF_DIM = 64
INPUT_DIM = 32   # embed dim E
N_LAYERS = 2
SEQ_LEN = 8      # L
BATCH = 2        # N
LN_EPS = 1e-5
NEG_INF = -1e30


def _layer_norm(x, w, b):
    mu = jnp.mean(x, axis=-1, keepdims=True)
    var = jnp.mean((x - mu) ** 2, axis=-1, keepdims=True)
    return (x - mu) * lax.rsqrt(var + LN_EPS) * w + b


def encoder_kernel(x_ref, mask_ref,
                   wqkv_ref, wout_ref, w1_ref, w2_ref, vec_ref,
                   o_ref, attn_scr, *, num_heads):
    """Whole encoder (all layers, all batch elements) in one invocation.

    x_ref   : (T, E)          fused token matrix, T = L * N
    mask_ref: (T, T)          additive attention mask (batch block + padding)
    wqkv_ref: (NL, E, 3E)     in_proj.weight.T per layer
    wout_ref: (NL, E, E)      out_proj.weight.T per layer
    w1_ref  : (NL, E, FF)     mlp[0].weight.T per layer
    w2_ref  : (NL, FF, E)     mlp[3].weight.T per layer
    vec_ref : (NL, 8, W)      packed 1-D params per layer (see pack order)
    attn_scr: (T, E) VMEM     per-head attention outputs gather buffer
    """
    T, E = x_ref.shape
    n_layers = wqkv_ref.shape[0]
    ff = w1_ref.shape[2]
    d = E // num_heads
    scale = 1.0 / (d ** 0.5)

    mask = mask_ref[...]                       # (T, T) additive
    x = x_ref[...].astype(jnp.float32)         # residual stream, all tokens

    for layer in range(n_layers):              # N_LAYERS is small -> unrolled
        vec = vec_ref[layer]                   # (8, W)
        ln1_w, ln1_b = vec[0:1, :E], vec[1:2, :E]
        ln2_w, ln2_b = vec[2:3, :E], vec[3:4, :E]
        out_b = vec[4:5, :E]
        mlp_b2 = vec[5:6, :E]
        mlp_b1 = vec[6:7, :ff]
        in_b = vec[7:8, :3 * E]

        w_qkv = wqkv_ref[layer]                # (E, 3E)
        w_out = wout_ref[layer]                # (E, E)
        w1 = w1_ref[layer]                     # (E, FF)
        w2 = w2_ref[layer]                     # (FF, E)

        # ---- attention block (pre-norm) -------------------------------
        x2 = _layer_norm(x, ln1_w, ln1_b)
        qkv = jnp.dot(x2, w_qkv, preferred_element_type=jnp.float32) + in_b

        for h in range(num_heads):
            qh = qkv[:, h * d:(h + 1) * d]                     # (T, d)
            kh = qkv[:, E + h * d:E + (h + 1) * d]             # (T, d)
            vh = qkv[:, 2 * E + h * d:2 * E + (h + 1) * d]     # (T, d)
            # q @ k.T without materialising the transpose.
            s = lax.dot_general(qh, kh, (((1,), (1,)), ((), ())),
                                preferred_element_type=jnp.float32)
            s = s * scale + mask
            s = s - jnp.max(s, axis=-1, keepdims=True)
            p = jnp.exp(s)
            p = p * pl.reciprocal(jnp.sum(p, axis=-1, keepdims=True),
                                  approx=True)
            attn_scr[:, h * d:(h + 1) * d] = jnp.dot(
                p, vh, preferred_element_type=jnp.float32)

        a = attn_scr[...]                                      # (T, E)
        attn_out = jnp.dot(a, w_out,
                           preferred_element_type=jnp.float32) + out_b
        x = x + attn_out          # attn_dropout is identity at inference

        # ---- MLP block (pre-norm) --------------------------------------
        x2 = _layer_norm(x, ln2_w, ln2_b)
        hmid = jnp.dot(x2, w1, preferred_element_type=jnp.float32) + mlp_b1
        hmid = jnp.maximum(hmid, 0.0)
        y = jnp.dot(hmid, w2, preferred_element_type=jnp.float32) + mlp_b2
        x = x + y

    o_ref[...] = x.astype(o_ref.dtype)


def pack_encoder_params(params_list, ff_dim=FF_DIM):
    """Pre-pack per-layer PyTorch-style params into kernel-friendly slabs."""
    E = params_list[0]["ln1_w"].shape[0]
    W = max(3 * E, ff_dim)

    def pad(v):
        return jnp.pad(v.astype(jnp.float32), (0, W - v.shape[0]))

    wqkv = jnp.stack([p["in_proj_w"].T for p in params_list])    # (NL, E, 3E)
    wout = jnp.stack([p["out_proj_w"].T for p in params_list])   # (NL, E, E)
    w1 = jnp.stack([p["mlp_w1"].T for p in params_list])         # (NL, E, FF)
    w2 = jnp.stack([p["mlp_w2"].T for p in params_list])         # (NL, FF, E)
    vec = jnp.stack([
        jnp.stack([pad(p["ln1_w"]), pad(p["ln1_b"]),
                   pad(p["ln2_w"]), pad(p["ln2_b"]),
                   pad(p["out_proj_b"]), pad(p["mlp_b2"]),
                   pad(p["mlp_b1"]), pad(p["in_proj_b"])])
        for p in params_list])                                    # (NL, 8, W)
    return {"wqkv": wqkv, "wout": wout, "w1": w1, "w2": w2, "vec": vec}


def _build_additive_mask(L, N, key_padding_mask=None):
    """(T, T) additive mask; token t -> batch t % N, position t // N."""
    T = L * N
    tok = jnp.arange(T, dtype=jnp.int32)
    batch_of = tok % N
    pos_of = tok // N
    allow = batch_of[:, None] == batch_of[None, :]
    if key_padding_mask is not None:
        # PyTorch convention: True => ignore this key position.
        key_ok = jnp.logical_not(key_padding_mask[batch_of, pos_of])  # (T,)
        allow = jnp.logical_and(allow, key_ok[None, :])
    return jnp.where(allow, 0.0, NEG_INF).astype(jnp.float32)


def transformer_encoder(x_lne, packed, num_heads=N_HEADS,
                        key_padding_mask=None):
    """x_lne: (L, N, E) float32, PyTorch (seq, batch, embed) convention."""
    L, N, E = x_lne.shape
    T = L * N
    x_tok = x_lne.reshape(T, E)            # contiguous reshape (free), (l, n) row order
    mask = _build_additive_mask(L, N, key_padding_mask)

    vmem = pl.BlockSpec(memory_space=pltpu.MemorySpace.VMEM)
    out = pl.pallas_call(
        functools.partial(encoder_kernel, num_heads=num_heads),
        out_shape=jax.ShapeDtypeStruct((T, E), x_lne.dtype),
        in_specs=[vmem] * 7,
        out_specs=vmem,
        scratch_shapes=[pltpu.VMEM((T, E), jnp.float32)],
    )(x_tok, mask, packed["wqkv"], packed["wout"], packed["w1"],
      packed["w2"], packed["vec"])

    return out.reshape(L, N, E)


# ----------------------------- pure-JAX reference -----------------------------
def reference_forward(x_lne, params_list, num_heads=N_HEADS,
                      key_padding_mask=None):
    L, N, E = x_lne.shape
    d = E // num_heads

    def ln(t, w, b):
        mu = t.mean(-1, keepdims=True)
        var = ((t - mu) ** 2).mean(-1, keepdims=True)
        return (t - mu) / jnp.sqrt(var + LN_EPS) * w + b

    x = x_lne
    for p in params_list:
        x2 = ln(x, p["ln1_w"], p["ln1_b"])
        qkv = x2 @ p["in_proj_w"].T + p["in_proj_b"]   # (L, N, 3E)
        q, k, v = qkv[..., :E], qkv[..., E:2 * E], qkv[..., 2 * E:]

        def heads(t):   # (L,N,E) -> (N,H,L,d)
            return t.transpose(1, 0, 2).reshape(N, L, num_heads, d).transpose(0, 2, 1, 3)

        qh, kh, vh = heads(q), heads(k), heads(v)
        s = jnp.einsum("nhld,nhmd->nhlm", qh, kh) / jnp.sqrt(d)
        if key_padding_mask is not None:
            s = jnp.where(key_padding_mask[:, None, None, :], NEG_INF, s)
        pr = jax.nn.softmax(s, axis=-1)
        a = jnp.einsum("nhlm,nhmd->nhld", pr, vh)
        a = a.transpose(0, 2, 1, 3).reshape(N, L, E).transpose(1, 0, 2)
        attn_out = a @ p["out_proj_w"].T + p["out_proj_b"]
        x = x + attn_out
        x2 = ln(x, p["ln2_w"], p["ln2_b"])
        h = jax.nn.relu(x2 @ p["mlp_w1"].T + p["mlp_b1"])
        y = h @ p["mlp_w2"].T + p["mlp_b2"]
        x = x + y
    return x


def init_layer_params(key, E=INPUT_DIM, ff=FF_DIM):
    ks = jax.random.split(key, 8)
    scale = 0.05
    return {
        "ln1_w": jnp.ones((E,), jnp.float32),
        "ln1_b": jnp.zeros((E,), jnp.float32),
        "in_proj_w": scale * jax.random.normal(ks[0], (3 * E, E), jnp.float32),
        "in_proj_b": scale * jax.random.normal(ks[1], (3 * E,), jnp.float32),
        "out_proj_w": scale * jax.random.normal(ks[2], (E, E), jnp.float32),
        "out_proj_b": scale * jax.random.normal(ks[3], (E,), jnp.float32),
        "ln2_w": jnp.ones((E,), jnp.float32),
        "ln2_b": jnp.zeros((E,), jnp.float32),
        "mlp_w1": scale * jax.random.normal(ks[4], (ff, E), jnp.float32),
        "mlp_b1": scale * jax.random.normal(ks[5], (ff,), jnp.float32),
        "mlp_w2": scale * jax.random.normal(ks[6], (E, ff), jnp.float32),
        "mlp_b2": scale * jax.random.normal(ks[7], (E,), jnp.float32),
    }


if __name__ == "__main__":
    key = jax.random.PRNGKey(0)
    kx, kp = jax.random.split(key)
    x = jax.random.normal(kx, (SEQ_LEN, BATCH, INPUT_DIM), jnp.float32)
    params_list = [init_layer_params(k)
                   for k in jax.random.split(kp, N_LAYERS)]
    packed = pack_encoder_params(params_list)

    # --- no mask -------------------------------------------------------------
    out = transformer_encoder(x, packed)
    out = jax.block_until_ready(out)
    ref = reference_forward(x, params_list)
    assert out.shape == ref.shape == (SEQ_LEN, BATCH, INPUT_DIM)
    assert jnp.allclose(out, ref, atol=2e-2, rtol=2e-2), (
        float(jnp.max(jnp.abs(out - ref))))

    # --- with key_padding_mask (True = ignore key) ---------------------------
    kpm = jnp.zeros((BATCH, SEQ_LEN), dtype=bool).at[1, -2:].set(True)
    out_m = transformer_encoder(x, packed, key_padding_mask=kpm)
    out_m = jax.block_until_ready(out_m)
    ref_m = reference_forward(x, params_list, key_padding_mask=kpm)
    assert jnp.allclose(out_m, ref_m, atol=2e-2, rtol=2e-2), (
        float(jnp.max(jnp.abs(out_m - ref_m))))

    print("KERNEL_OK")
</pallas_src>

<mosaic_0001>
module attributes {stable_mosaic.version = 11 : i64} {
  func.func @encoder_kernel(%arg0: memref<16x32xf32, #tpu.memory_space<vmem>>, %arg1: memref<16x16xf32, #tpu.memory_space<vmem>>, %arg2: memref<2x32x96xf32, #tpu.memory_space<vmem>>, %arg3: memref<2x32x32xf32, #tpu.memory_space<vmem>>, %arg4: memref<2x32x64xf32, #tpu.memory_space<vmem>>, %arg5: memref<2x64x32xf32, #tpu.memory_space<vmem>>, %arg6: memref<2x8x96xf32, #tpu.memory_space<vmem>>, %arg7: memref<16x32xf32, #tpu.memory_space<vmem>>, %arg8: memref<16x32xf32, #tpu.memory_space<vmem>>) attributes {dimension_semantics = [], scalar_prefetch = 0 : i64, scratch_operands = 1 : i64, tpu.core_type = #tpu.core_type<tc>} {
    %c0 = arith.constant 0 : index
    %c0_0 = arith.constant 0 : index
    %0 = vector.load %arg1[%c0, %c0_0] : memref<16x16xf32, #tpu.memory_space<vmem>>, vector<16x16xf32>
    %c0_1 = arith.constant 0 : index
    %c0_2 = arith.constant 0 : index
    %1 = vector.load %arg0[%c0_1, %c0_2] : memref<16x32xf32, #tpu.memory_space<vmem>>, vector<16x32xf32>
    %c0_3 = arith.constant 0 : index
    %c0_4 = arith.constant 0 : index
    %c0_5 = arith.constant 0 : index
    %2 = vector.load %arg6[%c0_3, %c0_4, %c0_5] : memref<2x8x96xf32, #tpu.memory_space<vmem>>, vector<1x8x96xf32>
    %3 = vector.shape_cast %2 : vector<1x8x96xf32> to vector<8x96xf32>
    %4 = vector.extract_strided_slice %3 {offsets = [0, 0], sizes = [1, 32], strides = [1, 1]} : vector<8x96xf32> to vector<1x32xf32>
    %5 = vector.extract_strided_slice %3 {offsets = [1, 0], sizes = [1, 32], strides = [1, 1]} : vector<8x96xf32> to vector<1x32xf32>
    %6 = vector.extract_strided_slice %3 {offsets = [2, 0], sizes = [1, 32], strides = [1, 1]} : vector<8x96xf32> to vector<1x32xf32>
    %7 = vector.extract_strided_slice %3 {offsets = [3, 0], sizes = [1, 32], strides = [1, 1]} : vector<8x96xf32> to vector<1x32xf32>
    %8 = vector.extract_strided_slice %3 {offsets = [4, 0], sizes = [1, 32], strides = [1, 1]} : vector<8x96xf32> to vector<1x32xf32>
    %9 = vector.extract_strided_slice %3 {offsets = [5, 0], sizes = [1, 32], strides = [1, 1]} : vector<8x96xf32> to vector<1x32xf32>
    %10 = vector.extract_strided_slice %3 {offsets = [6, 0], sizes = [1, 64], strides = [1, 1]} : vector<8x96xf32> to vector<1x64xf32>
    %11 = vector.extract_strided_slice %3 {offsets = [7, 0], sizes = [1, 96], strides = [1, 1]} : vector<8x96xf32> to vector<1x96xf32>
    %c0_6 = arith.constant 0 : index
    %c0_7 = arith.constant 0 : index
    %c0_8 = arith.constant 0 : index
    %12 = vector.load %arg2[%c0_6, %c0_7, %c0_8] : memref<2x32x96xf32, #tpu.memory_space<vmem>>, vector<1x32x96xf32>
    %13 = vector.shape_cast %12 : vector<1x32x96xf32> to vector<32x96xf32>
    %c0_9 = arith.constant 0 : index
    %c0_10 = arith.constant 0 : index
    %c0_11 = arith.constant 0 : index
    %14 = vector.load %arg3[%c0_9, %c0_10, %c0_11] : memref<2x32x32xf32, #tpu.memory_space<vmem>>, vector<1x32x32xf32>
    %15 = vector.shape_cast %14 : vector<1x32x32xf32> to vector<32x32xf32>
    %c0_12 = arith.constant 0 : index
    %c0_13 = arith.constant 0 : index
    %c0_14 = arith.constant 0 : index
    %16 = vector.load %arg4[%c0_12, %c0_13, %c0_14] : memref<2x32x64xf32, #tpu.memory_space<vmem>>, vector<1x32x64xf32>
    %17 = vector.shape_cast %16 : vector<1x32x64xf32> to vector<32x64xf32>
    %c0_15 = arith.constant 0 : index
    %c0_16 = arith.constant 0 : index
    %c0_17 = arith.constant 0 : index
    %18 = vector.load %arg5[%c0_15, %c0_16, %c0_17] : memref<2x64x32xf32, #tpu.memory_space<vmem>>, vector<1x64x32xf32>
    %19 = vector.shape_cast %18 : vector<1x64x32xf32> to vector<64x32xf32>
    %cst = arith.constant dense<0.000000e+00> : vector<16xf32>
    %20 = vector.multi_reduction <add>, %1, %cst [1] : vector<16x32xf32> to vector<16xf32>
    %21 = vector.shape_cast %20 : vector<16xf32> to vector<16x1xf32>
    %cst_18 = arith.constant 3.200000e+01 : f32
    %22 = vector.broadcast %cst_18 : f32 to vector<16x1xf32>
    %23 = arith.divf %21, %22 : vector<16x1xf32>
    %24 = vector.broadcast %23 : vector<16x1xf32> to vector<16x32xf32>
    %25 = arith.subf %1, %24 : vector<16x32xf32>
    %26 = arith.mulf %25, %25 : vector<16x32xf32>
    %cst_19 = arith.constant dense<0.000000e+00> : vector<16xf32>
    %27 = vector.multi_reduction <add>, %26, %cst_19 [1] : vector<16x32xf32> to vector<16xf32>
    %28 = vector.shape_cast %27 : vector<16xf32> to vector<16x1xf32>
    %cst_20 = arith.constant 3.200000e+01 : f32
    %29 = vector.broadcast %cst_20 : f32 to vector<16x1xf32>
    %30 = arith.divf %28, %29 : vector<16x1xf32>
    %31 = vector.broadcast %23 : vector<16x1xf32> to vector<16x32xf32>
    %32 = arith.subf %1, %31 : vector<16x32xf32>
    %cst_21 = arith.constant 9.99999974E-6 : f32
    %33 = vector.broadcast %cst_21 : f32 to vector<16x1xf32>
    %34 = arith.addf %30, %33 : vector<16x1xf32>
    %35 = math.rsqrt %34 : vector<16x1xf32>
    %36 = vector.broadcast %35 : vector<16x1xf32> to vector<16x32xf32>
    %37 = arith.mulf %32, %36 : vector<16x32xf32>
    %38 = vector.broadcast %4 : vector<1x32xf32> to vector<16x32xf32>
    %39 = arith.mulf %37, %38 : vector<16x32xf32>
    %40 = vector.broadcast %5 : vector<1x32xf32> to vector<16x32xf32>
    %41 = arith.addf %39, %40 : vector<16x32xf32>
    %cst_22 = arith.constant dense<0.000000e+00> : vector<16x96xf32>
    %42 = tpu.matmul %41, %13, %cst_22 {dimension_numbers = #tpu.dot_dimension_numbers<[1], [0], [0], [1], [0, 0, 1, 1], [], []>} : vector<16x32xf32>, vector<32x96xf32>, vector<16x96xf32> -> vector<16x96xf32>
    %43 = vector.broadcast %11 : vector<1x96xf32> to vector<16x96xf32>
    %44 = arith.addf %42, %43 : vector<16x96xf32>
    %45 = vector.extract_strided_slice %44 {offsets = [0, 0], sizes = [16, 8], strides = [1, 1]} : vector<16x96xf32> to vector<16x8xf32>
    %46 = vector.extract_strided_slice %44 {offsets = [0, 32], sizes = [16, 8], strides = [1, 1]} : vector<16x96xf32> to vector<16x8xf32>
    %47 = vector.extract_strided_slice %44 {offsets = [0, 64], sizes = [16, 8], strides = [1, 1]} : vector<16x96xf32> to vector<16x8xf32>
    %cst_23 = arith.constant dense<0.000000e+00> : vector<16x16xf32>
    %48 = tpu.matmul %45, %46, %cst_23 {dimension_numbers = #tpu.dot_dimension_numbers<[1], [1], [0], [0], [0, 0, 1, 0], [], []>} : vector<16x8xf32>, vector<16x8xf32>, vector<16x16xf32> -> vector<16x16xf32>
    %cst_24 = arith.constant 0.353553385 : f32
    %49 = vector.broadcast %cst_24 : f32 to vector<16x16xf32>
    %50 = arith.mulf %48, %49 : vector<16x16xf32>
    %51 = arith.addf %50, %0 : vector<16x16xf32>
    %cst_25 = arith.constant dense<0xFF800000> : vector<16xf32>
    %52 = vector.multi_reduction <maximumf>, %51, %cst_25 [1] : vector<16x16xf32> to vector<16xf32>
    %53 = vector.shape_cast %52 : vector<16xf32> to vector<16x1xf32>
    %54 = vector.broadcast %53 : vector<16x1xf32> to vector<16x16xf32>
    %55 = arith.subf %51, %54 : vector<16x16xf32>
    %56 = math.exp %55 : vector<16x16xf32>
    %cst_26 = arith.constant dense<0.000000e+00> : vector<16xf32>
    %57 = vector.multi_reduction <add>, %56, %cst_26 [1] : vector<16x16xf32> to vector<16xf32>
    %58 = vector.shape_cast %57 : vector<16xf32> to vector<16x1xf32>
    %59 = tpu.reciprocal %58 {approx = true} : vector<16x1xf32> -> vector<16x1xf32>
    %60 = vector.broadcast %59 : vector<16x1xf32> to vector<16x16xf32>
    %61 = arith.mulf %56, %60 : vector<16x16xf32>
    %cst_27 = arith.constant dense<0.000000e+00> : vector<16x8xf32>
    %62 = tpu.matmul %61, %47, %cst_27 {dimension_numbers = #tpu.dot_dimension_numbers<[1], [0], [0], [1], [0, 0, 1, 1], [], []>} : vector<16x16xf32>, vector<16x8xf32>, vector<16x8xf32> -> vector<16x8xf32>
    %c0_28 = arith.constant 0 : index
    %c0_29 = arith.constant 0 : index
    %63 = vector.load %arg8[%c0_28, %c0_29] : memref<16x32xf32, #tpu.memory_space<vmem>>, vector<16x8xf32>
    tpu.vector_store %arg8[%c0_28, %c0_29], %62 {strides = array<i32>} : memref<16x32xf32, #tpu.memory_space<vmem>>, vector<16x8xf32>,
    %64 = vector.extract_strided_slice %44 {offsets = [0, 8], sizes = [16, 8], strides = [1, 1]} : vector<16x96xf32> to vector<16x8xf32>
    %65 = vector.extract_strided_slice %44 {offsets = [0, 40], sizes = [16, 8], strides = [1, 1]} : vector<16x96xf32> to vector<16x8xf32>
    %66 = vector.extract_strided_slice %44 {offsets = [0, 72], sizes = [16, 8], strides = [1, 1]} : vector<16x96xf32> to vector<16x8xf32>
    %cst_30 = arith.constant dense<0.000000e+00> : vector<16x16xf32>
    %67 = tpu.matmul %64, %65, %cst_30 {dimension_numbers = #tpu.dot_dimension_numbers<[1], [1], [0], [0], [0, 0, 1, 0], [], []>} : vector<16x8xf32>, vector<16x8xf32>, vector<16x16xf32> -> vector<16x16xf32>
    %cst_31 = arith.constant 0.353553385 : f32
    %68 = vector.broadcast %cst_31 : f32 to vector<16x16xf32>
    %69 = arith.mulf %67, %68 : vector<16x16xf32>
    %70 = arith.addf %69, %0 : vector<16x16xf32>
    %cst_32 = arith.constant dense<0xFF800000> : vector<16xf32>
    %71 = vector.multi_reduction <maximumf>, %70, %cst_32 [1] : vector<16x16xf32> to vector<16xf32>
    %72 = vector.shape_cast %71 : vector<16xf32> to vector<16x1xf32>
    %73 = vector.broadcast %72 : vector<16x1xf32> to vector<16x16xf32>
    %74 = arith.subf %70, %73 : vector<16x16xf32>
    %75 = math.exp %74 : vector<16x16xf32>
    %cst_33 = arith.constant dense<0.000000e+00> : vector<16xf32>
    %76 = vector.multi_reduction <add>, %75, %cst_33 [1] : vector<16x16xf32> to vector<16xf32>
    %77 = vector.shape_cast %76 : vector<16xf32> to vector<16x1xf32>
    %78 = tpu.reciprocal %77 {approx = true} : vector<16x1xf32> -> vector<16x1xf32>
    %79 = vector.broadcast %78 : vector<16x1xf32> to vector<16x16xf32>
    %80 = arith.mulf %75, %79 : vector<16x16xf32>
    %cst_34 = arith.constant dense<0.000000e+00> : vector<16x8xf32>
    %81 = tpu.matmul %80, %66, %cst_34 {dimension_numbers = #tpu.dot_dimension_numbers<[1], [0], [0], [1], [0, 0, 1, 1], [], []>} : vector<16x16xf32>, vector<16x8xf32>, vector<16x8xf32> -> vector<16x8xf32>
    %c0_35 = arith.constant 0 : index
    %c8 = arith.constant 8 : index
    %82 = vector.load %arg8[%c0_35, %c8] : memref<16x32xf32, #tpu.memory_space<vmem>>, vector<16x8xf32>
    tpu.vector_store %arg8[%c0_35, %c8], %81 {strides = array<i32>} : memref<16x32xf32, #tpu.memory_space<vmem>>, vector<16x8xf32>,
    %83 = vector.extract_strided_slice %44 {offsets = [0, 16], sizes = [16, 8], strides = [1, 1]} : vector<16x96xf32> to vector<16x8xf32>
    %84 = vector.extract_strided_slice %44 {offsets = [0, 48], sizes = [16, 8], strides = [1, 1]} : vector<16x96xf32> to vector<16x8xf32>
    %85 = vector.extract_strided_slice %44 {offsets = [0, 80], sizes = [16, 8], strides = [1, 1]} : vector<16x96xf32> to vector<16x8xf32>
    %cst_36 = arith.constant dense<0.000000e+00> : vector<16x16xf32>
    %86 = tpu.matmul %83, %84, %cst_36 {dimension_numbers = #tpu.dot_dimension_numbers<[1], [1], [0], [0], [0, 0, 1, 0], [], []>} : vector<16x8xf32>, vector<16x8xf32>, vector<16x16xf32> -> vector<16x16xf32>
    %cst_37 = arith.constant 0.353553385 : f32
    %87 = vector.broadcast %cst_37 : f32 to vector<16x16xf32>
    %88 = arith.mulf %86, %87 : vector<16x16xf32>
    %89 = arith.addf %88, %0 : vector<16x16xf32>
    %cst_38 = arith.constant dense<0xFF800000> : vector<16xf32>
    %90 = vector.multi_reduction <maximumf>, %89, %cst_38 [1] : vector<16x16xf32> to vector<16xf32>
    %91 = vector.shape_cast %90 : vector<16xf32> to vector<16x1xf32>
    %92 = vector.broadcast %91 : vector<16x1xf32> to vector<16x16xf32>
    %93 = arith.subf %89, %92 : vector<16x16xf32>
    %94 = math.exp %93 : vector<16x16xf32>
    %cst_39 = arith.constant dense<0.000000e+00> : vector<16xf32>
    %95 = vector.multi_reduction <add>, %94, %cst_39 [1] : vector<16x16xf32> to vector<16xf32>
    %96 = vector.shape_cast %95 : vector<16xf32> to vector<16x1xf32>
    %97 = tpu.reciprocal %96 {approx = true} : vector<16x1xf32> -> vector<16x1xf32>
    %98 = vector.broadcast %97 : vector<16x1xf32> to vector<16x16xf32>
    %99 = arith.mulf %94, %98 : vector<16x16xf32>
    %cst_40 = arith.constant dense<0.000000e+00> : vector<16x8xf32>
    %100 = tpu.matmul %99, %85, %cst_40 {dimension_numbers = #tpu.dot_dimension_numbers<[1], [0], [0], [1], [0, 0, 1, 1], [], []>} : vector<16x16xf32>, vector<16x8xf32>, vector<16x8xf32> -> vector<16x8xf32>
    %c0_41 = arith.constant 0 : index
    %c16 = arith.constant 16 : index
    %101 = vector.load %arg8[%c0_41, %c16] : memref<16x32xf32, #tpu.memory_space<vmem>>, vector<16x8xf32>
    tpu.vector_store %arg8[%c0_41, %c16], %100 {strides = array<i32>} : memref<16x32xf32, #tpu.memory_space<vmem>>, vector<16x8xf32>,
    %102 = vector.extract_strided_slice %44 {offsets = [0, 24], sizes = [16, 8], strides = [1, 1]} : vector<16x96xf32> to vector<16x8xf32>
    %103 = vector.extract_strided_slice %44 {offsets = [0, 56], sizes = [16, 8], strides = [1, 1]} : vector<16x96xf32> to vector<16x8xf32>
    %104 = vector.extract_strided_slice %44 {offsets = [0, 88], sizes = [16, 8], strides = [1, 1]} : vector<16x96xf32> to vector<16x8xf32>
    %cst_42 = arith.constant dense<0.000000e+00> : vector<16x16xf32>
    %105 = tpu.matmul %102, %103, %cst_42 {dimension_numbers = #tpu.dot_dimension_numbers<[1], [1], [0], [0], [0, 0, 1, 0], [], []>} : vector<16x8xf32>, vector<16x8xf32>, vector<16x16xf32> -> vector<16x16xf32>
    %cst_43 = arith.constant 0.353553385 : f32
    %106 = vector.broadcast %cst_43 : f32 to vector<16x16xf32>
    %107 = arith.mulf %105, %106 : vector<16x16xf32>
    %108 = arith.addf %107, %0 : vector<16x16xf32>
    %cst_44 = arith.constant dense<0xFF800000> : vector<16xf32>
    %109 = vector.multi_reduction <maximumf>, %108, %cst_44 [1] : vector<16x16xf32> to vector<16xf32>
    %110 = vector.shape_cast %109 : vector<16xf32> to vector<16x1xf32>
    %111 = vector.broadcast %110 : vector<16x1xf32> to vector<16x16xf32>
    %112 = arith.subf %108, %111 : vector<16x16xf32>
    %113 = math.exp %112 : vector<16x16xf32>
    %cst_45 = arith.constant dense<0.000000e+00> : vector<16xf32>
    %114 = vector.multi_reduction <add>, %113, %cst_45 [1] : vector<16x16xf32> to vector<16xf32>
    %115 = vector.shape_cast %114 : vector<16xf32> to vector<16x1xf32>
    %116 = tpu.reciprocal %115 {approx = true} : vector<16x1xf32> -> vector<16x1xf32>
    %117 = vector.broadcast %116 : vector<16x1xf32> to vector<16x16xf32>
    %118 = arith.mulf %113, %117 : vector<16x16xf32>
    %cst_46 = arith.constant dense<0.000000e+00> : vector<16x8xf32>
    %119 = tpu.matmul %118, %104, %cst_46 {dimension_numbers = #tpu.dot_dimension_numbers<[1], [0], [0], [1], [0, 0, 1, 1], [], []>} : vector<16x16xf32>, vector<16x8xf32>, vector<16x8xf32> -> vector<16x8xf32>
    %c0_47 = arith.constant 0 : index
    %c24 = arith.constant 24 : index
    %120 = vector.load %arg8[%c0_47, %c24] : memref<16x32xf32, #tpu.memory_space<vmem>>, vector<16x8xf32>
    tpu.vector_store %arg8[%c0_47, %c24], %119 {strides = array<i32>} : memref<16x32xf32, #tpu.memory_space<vmem>>, vector<16x8xf32>,
    %c0_48 = arith.constant 0 : index
    %c0_49 = arith.constant 0 : index
    %121 = vector.load %arg8[%c0_48, %c0_49] : memref<16x32xf32, #tpu.memory_space<vmem>>, vector<16x32xf32>
    %cst_50 = arith.constant dense<0.000000e+00> : vector<16x32xf32>
    %122 = tpu.matmul %121, %15, %cst_50 {dimension_numbers = #tpu.dot_dimension_numbers<[1], [0], [0], [1], [0, 0, 1, 1], [], []>} : vector<16x32xf32>, vector<32x32xf32>, vector<16x32xf32> -> vector<16x32xf32>
    %123 = vector.broadcast %8 : vector<1x32xf32> to vector<16x32xf32>
    %124 = arith.addf %122, %123 : vector<16x32xf32>
    %125 = arith.addf %1, %124 : vector<16x32xf32>
    %cst_51 = arith.constant dense<0.000000e+00> : vector<16xf32>
    %126 = vector.multi_reduction <add>, %125, %cst_51 [1] : vector<16x32xf32> to vector<16xf32>
    %127 = vector.shape_cast %126 : vector<16xf32> to vector<16x1xf32>
    %cst_52 = arith.constant 3.200000e+01 : f32
    %128 = vector.broadcast %cst_52 : f32 to vector<16x1xf32>
    %129 = arith.divf %127, %128 : vector<16x1xf32>
    %130 = vector.broadcast %129 : vector<16x1xf32> to vector<16x32xf32>
    %131 = arith.subf %125, %130 : vector<16x32xf32>
    %132 = arith.mulf %131, %131 : vector<16x32xf32>
    %cst_53 = arith.constant dense<0.000000e+00> : vector<16xf32>
    %133 = vector.multi_reduction <add>, %132, %cst_53 [1] : vector<16x32xf32> to vector<16xf32>
    %134 = vector.shape_cast %133 : vector<16xf32> to vector<16x1xf32>
    %cst_54 = arith.constant 3.200000e+01 : f32
    %135 = vector.broadcast %cst_54 : f32 to vector<16x1xf32>
    %136 = arith.divf %134, %135 : vector<16x1xf32>
    %137 = vector.broadcast %129 : vector<16x1xf32> to vector<16x32xf32>
    %138 = arith.subf %125, %137 : vector<16x32xf32>
    %cst_55 = arith.constant 9.99999974E-6 : f32
    %139 = vector.broadcast %cst_55 : f32 to vector<16x1xf32>
    %140 = arith.addf %136, %139 : vector<16x1xf32>
    %141 = math.rsqrt %140 : vector<16x1xf32>
    %142 = vector.broadcast %141 : vector<16x1xf32> to vector<16x32xf32>
    %143 = arith.mulf %138, %142 : vector<16x32xf32>
    %144 = vector.broadcast %6 : vector<1x32xf32> to vector<16x32xf32>
    %145 = arith.mulf %143, %144 : vector<16x32xf32>
    %146 = vector.broadcast %7 : vector<1x32xf32> to vector<16x32xf32>
    %147 = arith.addf %145, %146 : vector<16x32xf32>
    %cst_56 = arith.constant dense<0.000000e+00> : vector<16x64xf32>
    %148 = tpu.matmul %147, %17, %cst_56 {dimension_numbers = #tpu.dot_dimension_numbers<[1], [0], [0], [1], [0, 0, 1, 1], [], []>} : vector<16x32xf32>, vector<32x64xf32>, vector<16x64xf32> -> vector<16x64xf32>
    %149 = vector.broadcast %10 : vector<1x64xf32> to vector<16x64xf32>
    %150 = arith.addf %148, %149 : vector<16x64xf32>
    %cst_57 = arith.constant 0.000000e+00 : f32
    %151 = vector.broadcast %cst_57 : f32 to vector<16x64xf32>
    %152 = arith.maximumf %150, %151 : vector<16x64xf32>
    %cst_58 = arith.constant dense<0.000000e+00> : vector<16x32xf32>
    %153 = tpu.matmul %152, %19, %cst_58 {dimension_numbers = #tpu.dot_dimension_numbers<[1], [0], [0], [1], [0, 0, 1, 1], [], []>} : vector<16x64xf32>, vector<64x32xf32>, vector<16x32xf32> -> vector<16x32xf32>
    %154 = vector.broadcast %9 : vector<1x32xf32> to vector<16x32xf32>
    %155 = arith.addf %153, %154 : vector<16x32xf32>
    %156 = arith.addf %125, %155 : vector<16x32xf32>
    %c1 = arith.constant 1 : index
    %c0_59 = arith.constant 0 : index
    %c0_60 = arith.constant 0 : index
    %157 = vector.load %arg6[%c1, %c0_59, %c0_60] : memref<2x8x96xf32, #tpu.memory_space<vmem>>, vector<1x8x96xf32>
    %158 = vector.shape_cast %157 : vector<1x8x96xf32> to vector<8x96xf32>
    %159 = vector.extract_strided_slice %158 {offsets = [0, 0], sizes = [1, 32], strides = [1, 1]} : vector<8x96xf32> to vector<1x32xf32>
    %160 = vector.extract_strided_slice %158 {offsets = [1, 0], sizes = [1, 32], strides = [1, 1]} : vector<8x96xf32> to vector<1x32xf32>
    %161 = vector.extract_strided_slice %158 {offsets = [2, 0], sizes = [1, 32], strides = [1, 1]} : vector<8x96xf32> to vector<1x32xf32>
    %162 = vector.extract_strided_slice %158 {offsets = [3, 0], sizes = [1, 32], strides = [1, 1]} : vector<8x96xf32> to vector<1x32xf32>
    %163 = vector.extract_strided_slice %158 {offsets = [4, 0], sizes = [1, 32], strides = [1, 1]} : vector<8x96xf32> to vector<1x32xf32>
    %164 = vector.extract_strided_slice %158 {offsets = [5, 0], sizes = [1, 32], strides = [1, 1]} : vector<8x96xf32> to vector<1x32xf32>
    %165 = vector.extract_strided_slice %158 {offsets = [6, 0], sizes = [1, 64], strides = [1, 1]} : vector<8x96xf32> to vector<1x64xf32>
    %166 = vector.extract_strided_slice %158 {offsets = [7, 0], sizes = [1, 96], strides = [1, 1]} : vector<8x96xf32> to vector<1x96xf32>
    %c1_61 = arith.constant 1 : index
    %c0_62 = arith.constant 0 : index
    %c0_63 = arith.constant 0 : index
    %167 = vector.load %arg2[%c1_61, %c0_62, %c0_63] : memref<2x32x96xf32, #tpu.memory_space<vmem>>, vector<1x32x96xf32>
    %168 = vector.shape_cast %167 : vector<1x32x96xf32> to vector<32x96xf32>
    %c1_64 = arith.constant 1 : index
    %c0_65 = arith.constant 0 : index
    %c0_66 = arith.constant 0 : index
    %169 = vector.load %arg3[%c1_64, %c0_65, %c0_66] : memref<2x32x32xf32, #tpu.memory_space<vmem>>, vector<1x32x32xf32>
    %170 = vector.shape_cast %169 : vector<1x32x32xf32> to vector<32x32xf32>
    %c1_67 = arith.constant 1 : index
    %c0_68 = arith.constant 0 : index
    %c0_69 = arith.constant 0 : index
    %171 = vector.load %arg4[%c1_67, %c0_68, %c0_69] : memref<2x32x64xf32, #tpu.memory_space<vmem>>, vector<1x32x64xf32>
    %172 = vector.shape_cast %171 : vector<1x32x64xf32> to vector<32x64xf32>
    %c1_70 = arith.constant 1 : index
    %c0_71 = arith.constant 0 : index
    %c0_72 = arith.constant 0 : index
    %173 = vector.load %arg5[%c1_70, %c0_71, %c0_72] : memref<2x64x32xf32, #tpu.memory_space<vmem>>, vector<1x64x32xf32>
    %174 = vector.shape_cast %173 : vector<1x64x32xf32> to vector<64x32xf32>
    %cst_73 = arith.constant dense<0.000000e+00> : vector<16xf32>
    %175 = vector.multi_reduction <add>, %156, %cst_73 [1] : vector<16x32xf32> to vector<16xf32>
    %176 = vector.shape_cast %175 : vector<16xf32> to vector<16x1xf32>
    %cst_74 = arith.constant 3.200000e+01 : f32
    %177 = vector.broadcast %cst_74 : f32 to vector<16x1xf32>
    %178 = arith.divf %176, %177 : vector<16x1xf32>
    %179 = vector.broadcast %178 : vector<16x1xf32> to vector<16x32xf32>
    %180 = arith.subf %156, %179 : vector<16x32xf32>
    %181 = arith.mulf %180, %180 : vector<16x32xf32>
    %cst_75 = arith.constant dense<0.000000e+00> : vector<16xf32>
    %182 = vector.multi_reduction <add>, %181, %cst_75 [1] : vector<16x32xf32> to vector<16xf32>
    %183 = vector.shape_cast %182 : vector<16xf32> to vector<16x1xf32>
    %cst_76 = arith.constant 3.200000e+01 : f32
    %184 = vector.broadcast %cst_76 : f32 to vector<16x1xf32>
    %185 = arith.divf %183, %184 : vector<16x1xf32>
    %186 = vector.broadcast %178 : vector<16x1xf32> to vector<16x32xf32>
    %187 = arith.subf %156, %186 : vector<16x32xf32>
    %cst_77 = arith.constant 9.99999974E-6 : f32
    %188 = vector.broadcast %cst_77 : f32 to vector<16x1xf32>
    %189 = arith.addf %185, %188 : vector<16x1xf32>
    %190 = math.rsqrt %189 : vector<16x1xf32>
    %191 = vector.broadcast %190 : vector<16x1xf32> to vector<16x32xf32>
    %192 = arith.mulf %187, %191 : vector<16x32xf32>
    %193 = vector.broadcast %159 : vector<1x32xf32> to vector<16x32xf32>
    %194 = arith.mulf %192, %193 : vector<16x32xf32>
    %195 = vector.broadcast %160 : vector<1x32xf32> to vector<16x32xf32>
    %196 = arith.addf %194, %195 : vector<16x32xf32>
    %cst_78 = arith.constant dense<0.000000e+00> : vector<16x96xf32>
    %197 = tpu.matmul %196, %168, %cst_78 {dimension_numbers = #tpu.dot_dimension_numbers<[1], [0], [0], [1], [0, 0, 1, 1], [], []>} : vector<16x32xf32>, vector<32x96xf32>, vector<16x96xf32> -> vector<16x96xf32>
    %198 = vector.broadcast %166 : vector<1x96xf32> to vector<16x96xf32>
    %199 = arith.addf %197, %198 : vector<16x96xf32>
    %200 = vector.extract_strided_slice %199 {offsets = [0, 0], sizes = [16, 8], strides = [1, 1]} : vector<16x96xf32> to vector<16x8xf32>
    %201 = vector.extract_strided_slice %199 {offsets = [0, 32], sizes = [16, 8], strides = [1, 1]} : vector<16x96xf32> to vector<16x8xf32>
    %202 = vector.extract_strided_slice %199 {offsets = [0, 64], sizes = [16, 8], strides = [1, 1]} : vector<16x96xf32> to vector<16x8xf32>
    %cst_79 = arith.constant dense<0.000000e+00> : vector<16x16xf32>
    %203 = tpu.matmul %200, %201, %cst_79 {dimension_numbers = #tpu.dot_dimension_numbers<[1], [1], [0], [0], [0, 0, 1, 0], [], []>} : vector<16x8xf32>, vector<16x8xf32>, vector<16x16xf32> -> vector<16x16xf32>
    %cst_80 = arith.constant 0.353553385 : f32
    %204 = vector.broadcast %cst_80 : f32 to vector<16x16xf32>
    %205 = arith.mulf %203, %204 : vector<16x16xf32>
    %206 = arith.addf %205, %0 : vector<16x16xf32>
    %cst_81 = arith.constant dense<0xFF800000> : vector<16xf32>
    %207 = vector.multi_reduction <maximumf>, %206, %cst_81 [1] : vector<16x16xf32> to vector<16xf32>
    %208 = vector.shape_cast %207 : vector<16xf32> to vector<16x1xf32>
    %209 = vector.broadcast %208 : vector<16x1xf32> to vector<16x16xf32>
    %210 = arith.subf %206, %209 : vector<16x16xf32>
    %211 = math.exp %210 : vector<16x16xf32>
    %cst_82 = arith.constant dense<0.000000e+00> : vector<16xf32>
    %212 = vector.multi_reduction <add>, %211, %cst_82 [1] : vector<16x16xf32> to vector<16xf32>
    %213 = vector.shape_cast %212 : vector<16xf32> to vector<16x1xf32>
    %214 = tpu.reciprocal %213 {approx = true} : vector<16x1xf32> -> vector<16x1xf32>
    %215 = vector.broadcast %214 : vector<16x1xf32> to vector<16x16xf32>
    %216 = arith.mulf %211, %215 : vector<16x16xf32>
    %cst_83 = arith.constant dense<0.000000e+00> : vector<16x8xf32>
    %217 = tpu.matmul %216, %202, %cst_83 {dimension_numbers = #tpu.dot_dimension_numbers<[1], [0], [0], [1], [0, 0, 1, 1], [], []>} : vector<16x16xf32>, vector<16x8xf32>, vector<16x8xf32> -> vector<16x8xf32>
    %c0_84 = arith.constant 0 : index
    %c0_85 = arith.constant 0 : index
    %218 = vector.load %arg8[%c0_84, %c0_85] : memref<16x32xf32, #tpu.memory_space<vmem>>, vector<16x8xf32>
    tpu.vector_store %arg8[%c0_84, %c0_85], %217 {strides = array<i32>} : memref<16x32xf32, #tpu.memory_space<vmem>>, vector<16x8xf32>,
    %219 = vector.extract_strided_slice %199 {offsets = [0, 8], sizes = [16, 8], strides = [1, 1]} : vector<16x96xf32> to vector<16x8xf32>
    %220 = vector.extract_strided_slice %199 {offsets = [0, 40], sizes = [16, 8], strides = [1, 1]} : vector<16x96xf32> to vector<16x8xf32>
    %221 = vector.extract_strided_slice %199 {offsets = [0, 72], sizes = [16, 8], strides = [1, 1]} : vector<16x96xf32> to vector<16x8xf32>
    %cst_86 = arith.constant dense<0.000000e+00> : vector<16x16xf32>
    %222 = tpu.matmul %219, %220, %cst_86 {dimension_numbers = #tpu.dot_dimension_numbers<[1], [1], [0], [0], [0, 0, 1, 0], [], []>} : vector<16x8xf32>, vector<16x8xf32>, vector<16x16xf32> -> vector<16x16xf32>
    %cst_87 = arith.constant 0.353553385 : f32
    %223 = vector.broadcast %cst_87 : f32 to vector<16x16xf32>
    %224 = arith.mulf %222, %223 : vector<16x16xf32>
    %225 = arith.addf %224, %0 : vector<16x16xf32>
    %cst_88 = arith.constant dense<0xFF800000> : vector<16xf32>
    %226 = vector.multi_reduction <maximumf>, %225, %cst_88 [1] : vector<16x16xf32> to vector<16xf32>
    %227 = vector.shape_cast %226 : vector<16xf32> to vector<16x1xf32>
    %228 = vector.broadcast %227 : vector<16x1xf32> to vector<16x16xf32>
    %229 = arith.subf %225, %228 : vector<16x16xf32>
    %230 = math.exp %229 : vector<16x16xf32>
    %cst_89 = arith.constant dense<0.000000e+00> : vector<16xf32>
    %231 = vector.multi_reduction <add>, %230, %cst_89 [1] : vector<16x16xf32> to vector<16xf32>
    %232 = vector.shape_cast %231 : vector<16xf32> to vector<16x1xf32>
    %233 = tpu.reciprocal %232 {approx = true} : vector<16x1xf32> -> vector<16x1xf32>
    %234 = vector.broadcast %233 : vector<16x1xf32> to vector<16x16xf32>
    %235 = arith.mulf %230, %234 : vector<16x16xf32>
    %cst_90 = arith.constant dense<0.000000e+00> : vector<16x8xf32>
    %236 = tpu.matmul %235, %221, %cst_90 {dimension_numbers = #tpu.dot_dimension_numbers<[1], [0], [0], [1], [0, 0, 1, 1], [], []>} : vector<16x16xf32>, vector<16x8xf32>, vector<16x8xf32> -> vector<16x8xf32>
    %c0_91 = arith.constant 0 : index
    %c8_92 = arith.constant 8 : index
    %237 = vector.load %arg8[%c0_91, %c8_92] : memref<16x32xf32, #tpu.memory_space<vmem>>, vector<16x8xf32>
    tpu.vector_store %arg8[%c0_91, %c8_92], %236 {strides = array<i32>} : memref<16x32xf32, #tpu.memory_space<vmem>>, vector<16x8xf32>,
    %238 = vector.extract_strided_slice %199 {offsets = [0, 16], sizes = [16, 8], strides = [1, 1]} : vector<16x96xf32> to vector<16x8xf32>
    %239 = vector.extract_strided_slice %199 {offsets = [0, 48], sizes = [16, 8], strides = [1, 1]} : vector<16x96xf32> to vector<16x8xf32>
    %240 = vector.extract_strided_slice %199 {offsets = [0, 80], sizes = [16, 8], strides = [1, 1]} : vector<16x96xf32> to vector<16x8xf32>
    %cst_93 = arith.constant dense<0.000000e+00> : vector<16x16xf32>
    %241 = tpu.matmul %238, %239, %cst_93 {dimension_numbers = #tpu.dot_dimension_numbers<[1], [1], [0], [0], [0, 0, 1, 0], [], []>} : vector<16x8xf32>, vector<16x8xf32>, vector<16x16xf32> -> vector<16x16xf32>
    %cst_94 = arith.constant 0.353553385 : f32
    %242 = vector.broadcast %cst_94 : f32 to vector<16x16xf32>
    %243 = arith.mulf %241, %242 : vector<16x16xf32>
    %244 = arith.addf %243, %0 : vector<16x16xf32>
    %cst_95 = arith.constant dense<0xFF800000> : vector<16xf32>
    %245 = vector.multi_reduction <maximumf>, %244, %cst_95 [1] : vector<16x16xf32> to vector<16xf32>
    %246 = vector.shape_cast %245 : vector<16xf32> to vector<16x1xf32>
    %247 = vector.broadcast %246 : vector<16x1xf32> to vector<16x16xf32>
    %248 = arith.subf %244, %247 : vector<16x16xf32>
    %249 = math.exp %248 : vector<16x16xf32>
    %cst_96 = arith.constant dense<0.000000e+00> : vector<16xf32>
    %250 = vector.multi_reduction <add>, %249, %cst_96 [1] : vector<16x16xf32> to vector<16xf32>
    %251 = vector.shape_cast %250 : vector<16xf32> to vector<16x1xf32>
    %252 = tpu.reciprocal %251 {approx = true} : vector<16x1xf32> -> vector<16x1xf32>
    %253 = vector.broadcast %252 : vector<16x1xf32> to vector<16x16xf32>
    %254 = arith.mulf %249, %253 : vector<16x16xf32>
    %cst_97 = arith.constant dense<0.000000e+00> : vector<16x8xf32>
    %255 = tpu.matmul %254, %240, %cst_97 {dimension_numbers = #tpu.dot_dimension_numbers<[1], [0], [0], [1], [0, 0, 1, 1], [], []>} : vector<16x16xf32>, vector<16x8xf32>, vector<16x8xf32> -> vector<16x8xf32>
    %c0_98 = arith.constant 0 : index
    %c16_99 = arith.constant 16 : index
    %256 = vector.load %arg8[%c0_98, %c16_99] : memref<16x32xf32, #tpu.memory_space<vmem>>, vector<16x8xf32>
    tpu.vector_store %arg8[%c0_98, %c16_99], %255 {strides = array<i32>} : memref<16x32xf32, #tpu.memory_space<vmem>>, vector<16x8xf32>,
    %257 = vector.extract_strided_slice %199 {offsets = [0, 24], sizes = [16, 8], strides = [1, 1]} : vector<16x96xf32> to vector<16x8xf32>
    %258 = vector.extract_strided_slice %199 {offsets = [0, 56], sizes = [16, 8], strides = [1, 1]} : vector<16x96xf32> to vector<16x8xf32>
    %259 = vector.extract_strided_slice %199 {offsets = [0, 88], sizes = [16, 8], strides = [1, 1]} : vector<16x96xf32> to vector<16x8xf32>
    %cst_100 = arith.constant dense<0.000000e+00> : vector<16x16xf32>
    %260 = tpu.matmul %257, %258, %cst_100 {dimension_numbers = #tpu.dot_dimension_numbers<[1], [1], [0], [0], [0, 0, 1, 0], [], []>} : vector<16x8xf32>, vector<16x8xf32>, vector<16x16xf32> -> vector<16x16xf32>
    %cst_101 = arith.constant 0.353553385 : f32
    %261 = vector.broadcast %cst_101 : f32 to vector<16x16xf32>
    %262 = arith.mulf %260, %261 : vector<16x16xf32>
    %263 = arith.addf %262, %0 : vector<16x16xf32>
    %cst_102 = arith.constant dense<0xFF800000> : vector<16xf32>
    %264 = vector.multi_reduction <maximumf>, %263, %cst_102 [1] : vector<16x16xf32> to vector<16xf32>
    %265 = vector.shape_cast %264 : vector<16xf32> to vector<16x1xf32>
    %266 = vector.broadcast %265 : vector<16x1xf32> to vector<16x16xf32>
    %267 = arith.subf %263, %266 : vector<16x16xf32>
    %268 = math.exp %267 : vector<16x16xf32>
    %cst_103 = arith.constant dense<0.000000e+00> : vector<16xf32>
    %269 = vector.multi_reduction <add>, %268, %cst_103 [1] : vector<16x16xf32> to vector<16xf32>
    %270 = vector.shape_cast %269 : vector<16xf32> to vector<16x1xf32>
    %271 = tpu.reciprocal %270 {approx = true} : vector<16x1xf32> -> vector<16x1xf32>
    %272 = vector.broadcast %271 : vector<16x1xf32> to vector<16x16xf32>
    %273 = arith.mulf %268, %272 : vector<16x16xf32>
    %cst_104 = arith.constant dense<0.000000e+00> : vector<16x8xf32>
    %274 = tpu.matmul %273, %259, %cst_104 {dimension_numbers = #tpu.dot_dimension_numbers<[1], [0], [0], [1], [0, 0, 1, 1], [], []>} : vector<16x16xf32>, vector<16x8xf32>, vector<16x8xf32> -> vector<16x8xf32>
    %c0_105 = arith.constant 0 : index
    %c24_106 = arith.constant 24 : index
    %275 = vector.load %arg8[%c0_105, %c24_106] : memref<16x32xf32, #tpu.memory_space<vmem>>, vector<16x8xf32>
    tpu.vector_store %arg8[%c0_105, %c24_106], %274 {strides = array<i32>} : memref<16x32xf32, #tpu.memory_space<vmem>>, vector<16x8xf32>,
    %c0_107 = arith.constant 0 : index
    %c0_108 = arith.constant 0 : index
    %276 = vector.load %arg8[%c0_107, %c0_108] : memref<16x32xf32, #tpu.memory_space<vmem>>, vector<16x32xf32>
    %cst_109 = arith.constant dense<0.000000e+00> : vector<16x32xf32>
    %277 = tpu.matmul %276, %170, %cst_109 {dimension_numbers = #tpu.dot_dimension_numbers<[1], [0], [0], [1], [0, 0, 1, 1], [], []>} : vector<16x32xf32>, vector<32x32xf32>, vector<16x32xf32> -> vector<16x32xf32>
    %278 = vector.broadcast %163 : vector<1x32xf32> to vector<16x32xf32>
    %279 = arith.addf %277, %278 : vector<16x32xf32>
    %280 = arith.addf %156, %279 : vector<16x32xf32>
    %cst_110 = arith.constant dense<0.000000e+00> : vector<16xf32>
    %281 = vector.multi_reduction <add>, %280, %cst_110 [1] : vector<16x32xf32> to vector<16xf32>
    %282 = vector.shape_cast %281 : vector<16xf32> to vector<16x1xf32>
    %cst_111 = arith.constant 3.200000e+01 : f32
    %283 = vector.broadcast %cst_111 : f32 to vector<16x1xf32>
    %284 = arith.divf %282, %283 : vector<16x1xf32>
    %285 = vector.broadcast %284 : vector<16x1xf32> to vector<16x32xf32>
    %286 = arith.subf %280, %285 : vector<16x32xf32>
    %287 = arith.mulf %286, %286 : vector<16x32xf32>
    %cst_112 = arith.constant dense<0.000000e+00> : vector<16xf32>
    %288 = vector.multi_reduction <add>, %287, %cst_112 [1] : vector<16x32xf32> to vector<16xf32>
    %289 = vector.shape_cast %288 : vector<16xf32> to vector<16x1xf32>
    %cst_113 = arith.constant 3.200000e+01 : f32
    %290 = vector.broadcast %cst_113 : f32 to vector<16x1xf32>
    %291 = arith.divf %289, %290 : vector<16x1xf32>
    %292 = vector.broadcast %284 : vector<16x1xf32> to vector<16x32xf32>
    %293 = arith.subf %280, %292 : vector<16x32xf32>
    %cst_114 = arith.constant 9.99999974E-6 : f32
    %294 = vector.broadcast %cst_114 : f32 to vector<16x1xf32>
    %295 = arith.addf %291, %294 : vector<16x1xf32>
    %296 = math.rsqrt %295 : vector<16x1xf32>
    %297 = vector.broadcast %296 : vector<16x1xf32> to vector<16x32xf32>
    %298 = arith.mulf %293, %297 : vector<16x32xf32>
    %299 = vector.broadcast %161 : vector<1x32xf32> to vector<16x32xf32>
    %300 = arith.mulf %298, %299 : vector<16x32xf32>
    %301 = vector.broadcast %162 : vector<1x32xf32> to vector<16x32xf32>
    %302 = arith.addf %300, %301 : vector<16x32xf32>
    %cst_115 = arith.constant dense<0.000000e+00> : vector<16x64xf32>
    %303 = tpu.matmul %302, %172, %cst_115 {dimension_numbers = #tpu.dot_dimension_numbers<[1], [0], [0], [1], [0, 0, 1, 1], [], []>} : vector<16x32xf32>, vector<32x64xf32>, vector<16x64xf32> -> vector<16x64xf32>
    %304 = vector.broadcast %165 : vector<1x64xf32> to vector<16x64xf32>
    %305 = arith.addf %303, %304 : vector<16x64xf32>
    %cst_116 = arith.constant 0.000000e+00 : f32
    %306 = vector.broadcast %cst_116 : f32 to vector<16x64xf32>
    %307 = arith.maximumf %305, %306 : vector<16x64xf32>
    %cst_117 = arith.constant dense<0.000000e+00> : vector<16x32xf32>
    %308 = tpu.matmul %307, %174, %cst_117 {dimension_numbers = #tpu.dot_dimension_numbers<[1], [0], [0], [1], [0, 0, 1, 1], [], []>} : vector<16x64xf32>, vector<64x32xf32>, vector<16x32xf32> -> vector<16x32xf32>
    %309 = vector.broadcast %164 : vector<1x32xf32> to vector<16x32xf32>
    %310 = arith.addf %308, %309 : vector<16x32xf32>
    %311 = arith.addf %280, %310 : vector<16x32xf32>
    %c0_118 = arith.constant 0 : index
    %c0_119 = arith.constant 0 : index
    %312 = vector.load %arg7[%c0_118, %c0_119] : memref<16x32xf32, #tpu.memory_space<vmem>>, vector<16x32xf32>
    tpu.vector_store %arg7[%c0_118, %c0_119], %311 {strides = array<i32>} : memref<16x32xf32, #tpu.memory_space<vmem>>, vector<16x32xf32>,
    return
  }
}

</mosaic_0001>

<bundles_post_ra>
// kernel: tpu_custom_call.1
= control target key start
LH: loop header
LB: loop body
LE: loop exit
PB: predicated region body
PF: predicated region fallthrough
CT: control target
= control target key end

     0   :  { %12 = vsyncpa [#allocation4], 0  ;;  %s4106_s0 = inlined_call_operand.hbm [shape: f32[16,32], index: 0, kind: input, shape index: {}]   ;;  %s4107_s1 = inlined_call_operand.hbm [shape: f32[16,16], index: 1, kind: input, shape index: {}]   ;;  %s4108_s2 = inlined_call_operand.vmem [shape: f32[2,32,96], index: 2, kind: input, shape index: {}]   ;;  %s4109_s3 = inlined_call_operand.vmem [shape: f32[2,32,32], index: 3, kind: input, shape index: {}]   ;;  %s4110_s4 = inlined_call_operand.vmem [shape: f32[2,32,64], index: 4, kind: input, shape index: {}]   ;;  %s4111_s5 = inlined_call_operand.vmem [shape: f32[2,64,32], index: 5, kind: input, shape index: {}]   ;;  %s4112_s6 = inlined_call_operand.vmem [shape: f32[2,8,96], index: 6, kind: input, shape index: {}]   ;;  %s4113_s7 = inlined_call_operand.hbm [shape: f32[16,32], index: 7, kind: output, shape index: {}]  }
   0x1   :  { %13 = vsyncpa [#allocation7], 0 }
   0x2   :  { %14 = vsyncpa [#allocation5], 0  ;;  %s3507_s24 = smov [#allocation3]   ;;  %s3435_s28 = scalar_lea.hbm %s4106_s0, 256 }
   0x3   :  { %s20_s25 = sshll.u32 %s3507_s24, 4  ;;  %p3436_p0 = scmp.ne.s32.totalorder %s4106_s0, %s3435_s28  ;;  %s21_s25 = int_to_ptr.vmem [resolvable:$true] %s20_s25 }
   0x4   :  { %p3439_p1 = scmp.lt.u32.totalorder %s3435_s28, %s4106_s0 }
   0x6   :  { %p3441_p2 = pnand %p3439_p1, %p3436_p0 }
   0x8   :  { %3444 = shalt.err (!%p3441_p2)
}
   0x9   :  { %s3445_s10 = scalar_lea.vmem %s21_s25, 256  ;;  %p3450_p4 = scmp.lt.s32.totalorder %s21_s25, %s21_s25 }
   0xa   :  { %p3446_p3 = scmp.ne.s32.totalorder %s21_s25, %s3445_s10  ;;  %p3451_p5 = scmp.lt.s32.totalorder %s3445_s10, %s3445_s10 }
   0xc   :  { %p3452_p6 = por %p3451_p5, %p3450_p4 }
   0xe   :  { %p3453_p7 = pnand %p3452_p6, %p3446_p3 }
  0x10   :  { %3456 = shalt.err (!%p3453_p7)
}
  0x11   :  { %s3508_s11 = smov 128   ;;  %s3509_s12 = smov 8  }
  0x12   :  { %26 = dma.hbm_to_vmem [thread:$0]  %s4106_s0, 256, %s21_s25, [#allocation4], %s3508_s11, %s3508_s11, %s3509_s12  }
  0x13   :  { %s3510_s15 = smov [#allocation6]   ;;  %s3457_s19 = scalar_lea.hbm %s4107_s1, 256 }
  0x14   :  { %s32_s16 = sshll.u32 %s3510_s15, 4  ;;  %p3458_p8 = scmp.ne.s32.totalorder %s4107_s1, %s3457_s19  ;;  %s33_s16 = int_to_ptr.vmem [resolvable:$true] %s32_s16 }
  0x15   :  { %p3461_p9 = scmp.lt.u32.totalorder %s3457_s19, %s4107_s1 }
  0x17   :  { %p3463_p10 = pnand %p3461_p9, %p3458_p8 }
  0x19   :  { %3466 = shalt.err (!%p3463_p10)
}
  0x1a   :  { %s3467_s24 = scalar_lea.vmem %s33_s16, 256  ;;  %p3472_p12 = scmp.lt.s32.totalorder %s33_s16, %s33_s16 }
  0x1b   :  { %p3468_p11 = scmp.ne.s32.totalorder %s33_s16, %s3467_s24  ;;  %p3473_p13 = scmp.lt.s32.totalorder %s3467_s24, %s3467_s24 }
  0x1d   :  { %p3474_p0 = por %p3473_p13, %p3472_p12 }
  0x1f   :  { %p3475_p1 = pnand %p3474_p0, %p3468_p11 }
  0x21   :  { %3478 = shalt.err (!%p3475_p1)
}
  0x22   :  { %38 = dma.hbm_to_vmem [thread:$0]  %s4107_s1, 256, %s33_s16, [#allocation7], %s3508_s11, %s3508_s11, %s3509_s12  }
  0x23   :  { %3501 = dma.done.wait [#allocation4], 256  }
  0x24   :  { %3502 = vsyncadd [#allocation4], 4294967040 }
  0x25   :  { %3503 = dma.done.wait [#allocation7], 256  }
  0x26   :  { %3504 = vsyncadd [#allocation7], 4294967040  ;;  %vm80_vm0 = vcmask 261120   ;;  %v3595_v0 = vld [vmem:[#allocation3] sm:$0xff]  ;;  %v3597_v1 = vld [vmem:[#allocation3 + $0x8] sm:$0xff]  ;;  %v108_v22 = vlaneseq  ;;  %vm211_vm1 = vcmask 64512  }
  0x27   :  { %v81_v2 = vsel %vm80_vm0, %v3595_v0, 0.0  ;;  %v84_v3 = vsel %vm80_vm0, %v3597_v1, 0.0  ;;  %v60_v14 = vld [vmem:[%s4108_s2] sm:$0xff]  ;;  %v61_v15 = vld [vmem:[%s4108_s2 + $0x8] sm:$0xff]  ;;  %v62_v16 = vld [vmem:[%s4108_s2 + $0x10] sm:$0xff]  ;;  %s3511_s14 = smov 88  }
  0x28   :  { %82 = vadd.xlane.f32.xlu0 %v81_v2  ;;  %v3095_v17 = vpack.c.bf16 %v61_v15, %v60_v14  ;;  %v63_v18 = vld [vmem:[%s4108_s2 + $0x18] sm:$0xff]  ;;  %v3619_v26 = vshrl.u32 %v108_v22, 7  ;;  %v3625_v29 = vld [vmem:[%s4112_s6] sm:$0xff]  ;;  %s3512_s15 = smov 96   ;;  %s3513_s16 = smov 120   ;;  %vm3660_vm2 = vmpackc.low %vm211_vm1, %vm211_vm1  ;;  %vm299_vm3 = vcmask 130048  }
  0x29   :  { %v3099_v19 = vpack.c.bf16 %v63_v18, %v62_v16  ;;  %v3676_v60 = vld [vmem:[#allocation6 + $0x8] sm:$0xff]  ;;  %v3678_v63 = vld [vmem:[#allocation6] sm:$0xff]  ;;  %s3514_s17 = smov 56   ;;  %s3515_s18 = smov 64   ;;  %vm623_vm4 = vcmask 130112   ;;  %vm838_vm5 = vcmask 195712  }
  0x2a   :  { %3096 = vmatprep.subr.bf16.mxu1 %v3095_v17  ;;  %v110_v28 = vsub.s32 0, %v3619_v26  ;;  %v116_v30 = vsub.s32 1, %v3619_v26  ;;  %v122_v41 = vsub.s32 7, %v3619_v26  ;;  %s3516_s19 = smov 80   ;;  %s3517_s20 = smov 112   ;;  %vm1053_vm6 = vcmask 261312  }
  0x2b   :  { %3098 = vmatpush3.bf16.msra.mxu1 %v3095_v17  ;;  %s3518_s21 = smov 48   ;;  %s3519_s22 = smov 104   ;;  %vm1274_vm7 = vcmask 523264  }
  0x2c   :  { %85 = vadd.xlane.f32.xlu0 %v84_v3  ;;  %3100 = vmatprep.subr.bf16.mxu1 %v3099_v19  ;;  %v111_v31 = vrot.slane %v3625_v29, %v110_v28  ;;  %v117_v34 = vrot.slane %v3625_v29, %v116_v30  ;;  %v123_v42 = vrot.slane %v3625_v29, %v122_v41  ;;  %s3520_s23 = smov 72   ;;  %s3521_s24 = smov 40  }
  0x2d   :  { %s3522_s0 = smov 16   ;;  %s3523_s9 = smov 24  }
  0x2f   :  { %3102 = vmatpush3.bf16.msra.mxu1 %v3099_v19 }
  0xb5   :  { %v83_v4 = vpop.xlane.xlu0 %82 }
  0xb6   :  { %v88_v5 = vmul.f32 0.03125, %v83_v4 }
  0xb8   :  { %v90_v6 = vsub.f32 %v3595_v0, %v88_v5 }
  0xb9   :  { %v86_v7 = vpop.xlane.xlu0 %85 }
  0xba   :  { %v89_v8 = vmul.f32 0.03125, %v86_v7  ;;  %v92_v9 = vmul.f32 %v90_v6, %v90_v6 }
  0xbc   :  { %v91_v10 = vsub.f32 %v3597_v1, %v89_v8  ;;  %v94_v11 = vsel %vm80_vm0, %v92_v9, 0.0 }
  0xbd   :  { %95 = vadd.xlane.f32.xlu1 %v94_v11 }
  0xbe   :  { %v93_v12 = vmul.f32 %v91_v10, %v91_v10 }
  0xc0   :  { %v97_v13 = vsel %vm80_vm0, %v93_v12, 0.0 }
  0xc1   :  { %98 = vadd.xlane.f32.xlu1 %v97_v13 }
 0x14a   :  { %v96_v20 = vpop.xlane.xlu1 %95 }
 0x14b   :  { %v100_v21 = vmul.f32 0.03125, %v96_v20 }
 0x14d   :  { %v102_v23 = vadd.f32 1e-05, %v100_v21 }
 0x14e   :  { %v99_v24 = vpop.xlane.xlu1 %98 }
 0x14f   :  { %3353 = vrsqrt.f32 %v102_v23  ;;  %v101_v25 = vmul.f32 0.03125, %v99_v24 }
 0x151   :  { %v103_v27 = vadd.f32 1e-05, %v101_v25 }
 0x153   :  { %3355 = vrsqrt.f32 %v103_v27 }
 0x159   :  { %v3354_v32 = vpop.eup %3353 }
 0x15a   :  { %v106_v33 = vmul.f32 %v3354_v32, %v90_v6 }
 0x15c   :  { %v112_v35 = vmul.f32 %v111_v31, %v106_v33 }
 0x15d   :  { %v3356_v36 = vpop.eup %3355 }
 0x15e   :  { %v107_v37 = vmul.f32 %v3356_v36, %v91_v10  ;;  %v118_v38 = vadd.f32 %v117_v34, %v112_v35 }
 0x160   :  { %v113_v39 = vmul.f32 %v111_v31, %v107_v37  ;;  %2887 = vmatprep.mubr.msk.f32.mxu1 %vm80_vm0, %v118_v38 }
 0x162   :  { %v119_v40 = vadd.f32 %v117_v34, %v113_v39 }
 0x164   :  { %2888 = vmatmul.mubr.msk.f32.vlgmr.msra.gmra.mrb[0].mxu1 %vm80_vm0, %v119_v40 }
 0x237   :  { %v2889_v43 = vpop.f32.mrb[0].mxu1 }
 0x238   :  { %v3640_v44 = vadd.f32 %v2889_v43, %v123_v42  ;;  %v196_v45 = vpop.f32.mrb[1].mxu1 }
 0x239   :  { %v3642_v46 = vadd.f32 %v196_v45, %v123_v42 }
 0x23b   :  { %2894 = vmatprep.mubr.msk.f32.mxu1 %vm211_vm1, %v3642_v46  ;;  %v3648_v47 = vpack.i.bf16 %v3640_v44, %v3642_v46 }
 0x23d   :  { %3279 = vrot.lane.b32.xlu1 %v3648_v47, %s3511_s14  ;;  %3274 = vrot.lane.b32.xlu0 %v3648_v47, %s3512_s15 }
 0x241   :  { %411 = vrot.lane.b32.xlu1 %v3642_v46, %s3513_s16 }
 0x245   :  { %413 = vrot.lane.b32.xlu1 %v3640_v44, %s3513_s16 }
 0x2af   :  { %v3280_v48 = vpop.permute.xlu1 %3279  ;;  %v3275_v49 = vpop.permute.xlu0 %3274 }
 0x2b0   :  { %v3282_v50 = vunpack.i.h.bf16 %v3280_v48  ;;  %v3281_v51 = vunpack.i.l.bf16 %v3280_v48  ;;  %v3277_v52 = vunpack.i.h.bf16 %v3275_v49  ;;  %v3276_v53 = vunpack.i.l.bf16 %v3275_v49 }
 0x2b2   :  { %v3103_v55 = vpack.c.bf16 %v3277_v52, %v3276_v53  ;;  %v3113_v56 = vpack.c.bf16 %v3282_v50, %v3281_v51 }
 0x2b3   :  { %v412_v57 = vpop.permute.xlu1 %411 }
 0x2b4   :  { %3105 = vmatprep.subr.msk.bf16.mxu1 %vm3660_vm2, %v3103_v55 }
 0x2b5   :  { %3108 = vmatpush3.bf16.xpose.msk.msra.mxu1 %vm3660_vm2, %v3103_v55 }
 0x2b6   :  { %3115 = vmatprep.subr.msk.bf16.mxu1 %vm3660_vm2, %v3113_v56 }
 0x2b7   :  { %v414_v58 = vpop.permute.xlu1 %413 }
 0x2bc   :  { %2895 = vmatmul.mubr.msk.f32.vlgmr.msra.gmra.mrb[2].mxu1 %vm211_vm1, %v3640_v44 }
 0x2bd   :  { %3118 = vmatpush3.bf16.xpose.msk.msra.mxu1 %vm3660_vm2, %v3113_v56  ;;  %2908 = vmatprep.mubr.msk.f32.mxu1 %vm211_vm1, %v412_v57 }
 0x2c4   :  { %2909 = vmatmul.mubr.msk.f32.vlgmr.msra.gmra.mrb[4].mxu1 %vm211_vm1, %v414_v58 }
 0x38f   :  { %v2896_v59 = vpop.f32.mrb[2].mxu1 }
 0x390   :  { %v296_v61 = vmul.f32 0.35355338, %v2896_v59  ;;  %v286_v62 = vpop.f32.mrb[3].mxu1 }
 0x391   :  { %v295_v2 = vmul.f32 0.35355338, %v286_v62 }
 0x392   :  { %v298_v3 = vadd.f32 %v296_v61, %v3676_v60 }
 0x393   :  { %v297_v4 = vadd.f32 %v295_v2, %v3678_v63 }
 0x394   :  { %v303_v5 = vsel %vm299_vm3, %v298_v3, -inf }
 0x395   :  { %304 = vmax.xlane.f32.xlu1 %v303_v5  ;;  %v300_v6 = vsel %vm299_vm3, %v297_v4, -inf }
 0x396   :  { %301 = vmax.xlane.f32.xlu0 %v300_v6 }
 0x397   :  { %v2910_v7 = vpop.f32.mrb[4].mxu1 }
 0x398   :  { %v493_v8 = vpop.f32.mrb[5].mxu1  ;;  %v503_v9 = vmul.f32 0.35355338, %v2910_v7 }
 0x399   :  { %v502_v10 = vmul.f32 0.35355338, %v493_v8 }
 0x39a   :  { %v505_v13 = vadd.f32 %v503_v9, %v3676_v60 }
 0x39b   :  { %v504_v11 = vadd.f32 %v502_v10, %v3678_v63 }
 0x39c   :  { %v509_v14 = vsel %vm299_vm3, %v505_v13, -inf }
 0x39d   :  { %v506_v12 = vsel %vm299_vm3, %v504_v11, -inf }
 0x39e   :  { %507 = vmax.xlane.f32.xlu0 %v506_v12 }
 0x3a2   :  { %510 = vmax.xlane.f32.xlu0 %v509_v14 }
 0x422   :  { %v305_v15 = vpop.xlane.xlu1 %304 }
 0x423   :  { %v307_v16 = vsub.f32 %v298_v3, %v305_v15  ;;  %v302_v17 = vpop.xlane.xlu0 %301 }
 0x424   :  { %v306_v18 = vsub.f32 %v297_v4, %v302_v17 }
 0x425   :  { %v310_v19 = vmul.f32 1.442695, %v307_v16 }
 0x426   :  { %v308_v20 = vmul.f32 1.442695, %v306_v18 }
 0x427   :  { %3357 = vpow2.f32 %v310_v19 }
 0x428   :  { %3359 = vpow2.f32 %v308_v20 }
 0x42b   :  { %v508_v21 = vpop.xlane.xlu0 %507 }
 0x42c   :  { %v512_v22 = vsub.f32 %v504_v11, %v508_v21 }
 0x42e   :  { %v514_v23 = vmul.f32 1.442695, %v512_v22 }
 0x42f   :  { %v511_v24 = vpop.xlane.xlu0 %510 }
 0x430   :  { %3361 = vpow2.f32 %v514_v23  ;;  %v513_v25 = vsub.f32 %v505_v13, %v511_v24 }
 0x431   :  { %v3358_v27 = vpop.eup %3357 }
 0x432   :  { %v3360_v31 = vpop.eup %3359  ;;  %v516_v32 = vmul.f32 1.442695, %v513_v25  ;;  %v315_v33 = vsel %vm299_vm3, %v3358_v27, 0.0 }
 0x433   :  { %316 = vadd.xlane.f32.xlu1 %v315_v33  ;;  %v312_v34 = vsel %vm299_vm3, %v3360_v31, 0.0 }
 0x434   :  { %3363 = vpow2.f32 %v516_v32  ;;  %313 = vadd.xlane.f32.xlu0 %v312_v34 }
 0x43a   :  { %v3362_v35 = vpop.eup %3361 }
 0x43b   :  { %v518_v36 = vsel %vm299_vm3, %v3362_v35, 0.0 }
 0x43c   :  { %519 = vadd.xlane.f32.xlu0 %v518_v36 }
 0x43e   :  { %v3364_v37 = vpop.eup %3363 }
 0x43f   :  { %v521_v38 = vsel %vm299_vm3, %v3364_v37, 0.0 }
 0x440   :  { %522 = vadd.xlane.f32.xlu1 %v521_v38 }
 0x451   :  { %3289 = vrot.lane.b32.xlu1 %v3648_v47, %s3514_s17 }
 0x452   :  { %3284 = vrot.lane.b32.xlu0 %v3648_v47, %s3515_s18 }
 0x455   :  { %3294 = vrot.lane.b32.xlu1 %v3648_v47, %s3516_s19 }
 0x456   :  { %628 = vrot.lane.b32.xlu0 %v3640_v44, %s3517_s20 }
 0x459   :  { %626 = vrot.lane.b32.xlu1 %v3642_v46, %s3517_s20 }
 0x4c0   :  { %v317_v40 = vpop.xlane.xlu1 %316 }
 0x4c1   :  { %v314_v39 = vpop.xlane.xlu0 %313 }
 0x4c2   :  { %3365 = vrcp.f32 %v314_v39 }
 0x4c3   :  { %3367 = vrcp.f32 %v317_v40 }
 0x4c9   :  { %v520_v42 = vpop.xlane.xlu0 %519 }
 0x4ca   :  { %3369 = vrcp.f32 %v520_v42 }
 0x4cc   :  { %v3366_v43 = vpop.eup %3365 }
 0x4cd   :  { %v523_v45 = vpop.xlane.xlu1 %522  ;;  %v3285_v48 = vpop.permute.xlu0 %3284  ;;  %v320_v49 = vmul.f32 %v3366_v43, %v3360_v31 }
 0x4ce   :  { %3371 = vrcp.f32 %v523_v45  ;;  %v3287_v50 = vunpack.i.h.bf16 %v3285_v48  ;;  %v3286_v51 = vunpack.i.l.bf16 %v3285_v48  ;;  %v3368_v53 = vpop.eup %3367 }
 0x4cf   :  { %2901 = vmatprep.mubr.msk.f32.mxu0 %vm299_vm3, %v320_v49  ;;  %v321_v61 = vmul.f32 %v3368_v53, %v3358_v27 }
 0x4d0   :  { %v3109_v52 = vpack.c.bf16 %v3287_v50, %v3286_v51 }
 0x4d1   :  { %v3290_v55 = vpop.permute.xlu1 %3289  ;;  %v629_v9 = vpop.permute.xlu0 %628 }
 0x4d2   :  { %v3292_v56 = vunpack.i.h.bf16 %v3290_v55  ;;  %v3291_v57 = vunpack.i.l.bf16 %v3290_v55  ;;  %3110 = vmatprep.subr.bf16.mxu0 %v3109_v52 }
 0x4d3   :  { %3112 = vmatpush3.bf16.msra.mxu0 %v3109_v52 }
 0x4d4   :  { %v3370_v58 = vpop.eup %3369  ;;  %v3119_v59 = vpack.c.bf16 %v3292_v56, %v3291_v57 }
 0x4d5   :  { %v3295_v62 = vpop.permute.xlu1 %3294  ;;  %v526_v2 = vmul.f32 %v3370_v58, %v3362_v35 }
 0x4d6   :  { %v3297_v3 = vunpack.i.h.bf16 %v3295_v62  ;;  %v3296_v4 = vunpack.i.l.bf16 %v3295_v62  ;;  %2902 = vmatmul.mubr.msk.f32.vlgmr.msra.gmra.mrb[0].mxu0 %vm299_vm3, %v321_v61  ;;  %3120 = vmatprep.subr.bf16.mxu0 %v3119_v59 }
 0x4d7   :  { %3122 = vmatpush3.bf16.msra.mxu0 %v3119_v59  ;;  %2915 = vmatprep.mubr.msk.f32.mxu0 %vm299_vm3, %v526_v2 }
 0x4d8   :  { %v3372_v5 = vpop.eup %3371  ;;  %v3123_v6 = vpack.c.bf16 %v3297_v3, %v3296_v4 }
 0x4d9   :  { %v527_v7 = vmul.f32 %v3372_v5, %v3364_v37  ;;  %v627_v8 = vpop.permute.xlu1 %626 }
 0x4da   :  { %3125 = vmatprep.subr.msk.bf16.mxu0 %vm3660_vm2, %v3123_v6 }
 0x4db   :  { %2916 = vmatmul.mubr.msk.f32.vlgmr.msra.gmra.mrb[2].mxu0 %vm299_vm3, %v527_v7 }
 0x4dc   :  { %2922 = vmatprep.mubr.msk.f32.mxu0 %vm211_vm1, %v627_v8 }
 0x4e0   :  { %3128 = vmatpush3.bf16.xpose.msk.msra.mxu0 %vm3660_vm2, %v3123_v6 }
 0x4e7   :  { %2923 = vmatmul.mubr.msk.f32.vlgmr.msra.gmra.mrb[4].mxu0 %vm211_vm1, %v629_v9 }
 0x5a9   :  { %v2903_v10 = vpop.f32.mrb[0].mxu0 }
 0x5aa   :  { %410 = vst.msk [vmem:[#allocation2 + $0x8] sm:$0xff] %vm211_vm1, %v2903_v10  ;;  %v400_v11 = vpop.f32.mrb[1].mxu0 }
 0x5ab   :  { %409 = vst.msk [vmem:[#allocation2] sm:$0xff] %vm211_vm1, %v400_v11 }
 0x5ae   :  { %v3714_v12 = vpop.f32.mrb[2].mxu0 }
 0x5af   :  { %v3716_v13 = vpop.f32.mrb[3].mxu0 }
 0x5ba   :  { %v2924_v14 = vpop.f32.mrb[4].mxu0 }
 0x5bb   :  { %v718_v15 = vmul.f32 0.35355338, %v2924_v14  ;;  %v708_v16 = vpop.f32.mrb[5].mxu0 }
 0x5bc   :  { %v717_v17 = vmul.f32 0.35355338, %v708_v16 }
 0x5bd   :  { %v720_v18 = vadd.f32 %v718_v15, %v3676_v60 }
 0x5be   :  { %v719_v19 = vadd.f32 %v717_v17, %v3678_v63 }
 0x5bf   :  { %v724_v20 = vsel %vm299_vm3, %v720_v18, -inf }
 0x5c0   :  { %725 = vmax.xlane.f32.xlu0 %v724_v20  ;;  %v721_v21 = vsel %vm299_vm3, %v719_v19, -inf }
 0x5c1   :  { %722 = vmax.xlane.f32.xlu1 %v721_v21 }
 0x5d2   :  { %3299 = vrot.lane.b32.xlu1 %v3648_v47, %s3518_s21 }
 0x5d6   :  { %841 = vrot.lane.b32.xlu1 %v3642_v46, %s3519_s22 }
 0x5da   :  { %843 = vrot.lane.b32.xlu1 %v3640_v44, %s3519_s22 }
 0x64d   :  { %v726_v22 = vpop.xlane.xlu0 %725 }
 0x64e   :  { %v728_v23 = vsub.f32 %v720_v18, %v726_v22  ;;  %v723_v24 = vpop.xlane.xlu1 %722 }
 0x64f   :  { %v727_v25 = vsub.f32 %v719_v19, %v723_v24 }
 0x650   :  { %v731_v27 = vmul.f32 1.442695, %v728_v23 }
 0x651   :  { %v729_v31 = vmul.f32 1.442695, %v727_v25 }
 0x652   :  { %3373 = vpow2.f32 %v731_v27  ;;  %v3300_v32 = vpop.permute.xlu1 %3299 }
 0x653   :  { %v3302_v33 = vunpack.i.h.bf16 %v3300_v32  ;;  %v3301_v34 = vunpack.i.l.bf16 %v3300_v32  ;;  %3375 = vpow2.f32 %v729_v31 }
 0x655   :  { %v3129_v35 = vpack.c.bf16 %v3302_v33, %v3301_v34  ;;  %v65_v33 = vld [vmem:[%s4109_s3 + $0x8] sm:$0xff] }
 0x656   :  { %v842_v52 = vpop.permute.xlu1 %841 }
 0x657   :  { %3130 = vmatprep.subr.bf16.mxu1 %v3129_v35 }
 0x658   :  { %3132 = vmatpush3.bf16.msra.mxu1 %v3129_v35  ;;  %v66_v35 = vld [vmem:[%s4109_s3 + $0x10] sm:$0xff] }
 0x65a   :  { %v844_v53 = vpop.permute.xlu1 %843 }
 0x65c   :  { %v3374_v36 = vpop.eup %3373 }
 0x65d   :  { %v736_v46 = vsel %vm299_vm3, %v3374_v36, 0.0  ;;  %v3376_v37 = vpop.eup %3375 }
 0x65e   :  { %737 = vadd.xlane.f32.xlu0 %v736_v46  ;;  %v733_v44 = vsel %vm299_vm3, %v3376_v37, 0.0 }
 0x662   :  { %734 = vadd.xlane.f32.xlu0 %v733_v44 }
 0x678   :  { %3304 = vrot.lane.b32.xlu0 %v3648_v47, %s3520_s23 }
 0x6eb   :  { %v738_v38 = vpop.xlane.xlu0 %737 }
 0x6ec   :  { %3377 = vrcp.f32 %v738_v38 }
 0x6ef   :  { %v735_v39 = vpop.xlane.xlu0 %734 }
 0x6f0   :  { %3379 = vrcp.f32 %v735_v39 }
 0x6f3   :  { %v3305_v40 = vpop.permute.xlu0 %3304 }
 0x6f4   :  { %v3307_v42 = vunpack.i.h.bf16 %v3305_v40  ;;  %v3306_v43 = vunpack.i.l.bf16 %v3305_v40 }
 0x6f6   :  { %v3133_v45 = vpack.c.bf16 %v3307_v42, %v3306_v43  ;;  %v3378_v48 = vpop.eup %3377  ;;  %v1060_v43 = vsub.s32 4, %v3619_v26 }
 0x6f7   :  { %v742_v51 = vmul.f32 %v3378_v48, %v3374_v36  ;;  %v67_v36 = vld [vmem:[%s4109_s3 + $0x18] sm:$0xff] }
 0x6f8   :  { %3135 = vmatprep.subr.msk.bf16.mxu1 %vm3660_vm2, %v3133_v45  ;;  %v3147_v46 = vpack.c.bf16 %v67_v36, %v66_v35 }
 0x6fa   :  { %v3380_v49 = vpop.eup %3379 }
 0x6fb   :  { %v741_v50 = vmul.f32 %v3380_v49, %v3376_v37 }
 0x6fd   :  { %2929 = vmatprep.mubr.msk.f32.mxu1 %vm299_vm3, %v741_v50 }
 0x6fe   :  { %2930 = vmatmul.mubr.msk.f32.vlgmr.msra.gmra.mrb[6].mxu1 %vm299_vm3, %v742_v51 }
 0x6ff   :  { %3138 = vmatpush3.bf16.xpose.msk.msra.mxu1 %vm3660_vm2, %v3133_v45  ;;  %2936 = vmatprep.mubr.msk.f32.mxu1 %vm211_vm1, %v842_v52  ;;  %v1061_v45 = vrot.slane %v3625_v29, %v1060_v43 }
 0x706   :  { %2937 = vmatmul.mubr.msk.f32.vlgmr.msra.gmra.mrb[8].mxu1 %vm211_vm1, %v844_v53 }
 0x7d1   :  { %v2931_v55 = vpop.f32.mrb[6].mxu1 }
 0x7d2   :  { %v821_v56 = vpop.f32.mrb[7].mxu1 }
 0x7d9   :  { %v2938_v57 = vpop.f32.mrb[8].mxu1 }
 0x7da   :  { %v933_v58 = vmul.f32 0.35355338, %v2938_v57  ;;  %v923_v59 = vpop.f32.mrb[9].mxu1 }
 0x7db   :  { %v932_v61 = vmul.f32 0.35355338, %v923_v59 }
 0x7dc   :  { %v935_v62 = vadd.f32 %v933_v58, %v3676_v60 }
 0x7dd   :  { %v934_v2 = vadd.f32 %v932_v61, %v3678_v63 }
 0x7de   :  { %v939_v3 = vsel %vm299_vm3, %v935_v62, -inf }
 0x7df   :  { %940 = vmax.xlane.f32.xlu0 %v939_v3  ;;  %v936_v4 = vsel %vm299_vm3, %v934_v2, -inf }
 0x7e0   :  { %937 = vmax.xlane.f32.xlu1 %v936_v4 }
 0x7f1   :  { %3309 = vrot.lane.b32.xlu1 %v3648_v47, %s3521_s24 }
 0x7f5   :  { %619 = vrot.lane.b32.xlu1 %v3714_v12, %s3509_s12 }
 0x7f9   :  { %832 = vrot.lane.b32.xlu1 %v821_v56, %s3522_s0 }
 0x7fd   :  { %834 = vrot.lane.b32.xlu1 %v2931_v55, %s3522_s0 }
 0x86c   :  { %v941_v5 = vpop.xlane.xlu0 %940 }
 0x86d   :  { %v943_v6 = vsub.f32 %v935_v62, %v941_v5  ;;  %v938_v7 = vpop.xlane.xlu1 %937  ;;  %v68_v5 = vld [vmem:[%s4110_s4] sm:$0xff] }
 0x86e   :  { %v942_v8 = vsub.f32 %v934_v2, %v938_v7 }
 0x86f   :  { %v946_v9 = vmul.f32 1.442695, %v943_v6  ;;  %v69_v6 = vld [vmem:[%s4110_s4 + $0x8] sm:$0xff] }
 0x870   :  { %v944_v10 = vmul.f32 1.442695, %v942_v8  ;;  %v3151_v7 = vpack.c.bf16 %v69_v6, %v68_v5  ;;  %v70_v8 = vld [vmem:[%s4110_s4 + $0x10] sm:$0xff] }
 0x871   :  { %v3310_v11 = vpop.permute.xlu1 %3309 }
 0x872   :  { %3381 = vpow2.f32 %v944_v10  ;;  %v3312_v14 = vunpack.i.h.bf16 %v3310_v11  ;;  %v3311_v15 = vunpack.i.l.bf16 %v3310_v11  ;;  %3152 = vmatprep.subr.bf16.mxu1 %v3151_v7  ;;  %v72_v11 = vld [vmem:[%s4111_s5] sm:$0xff] }
 0x873   :  { %3383 = vpow2.f32 %v946_v9  ;;  %3154 = vmatpush3.bf16.msra.mxu1 %v3151_v7  ;;  %v71_v9 = vld [vmem:[%s4110_s4 + $0x18] sm:$0xff] }
 0x874   :  { %v3139_v47 = vpack.c.bf16 %v3312_v14, %v3311_v15  ;;  %v3155_v10 = vpack.c.bf16 %v71_v9, %v70_v8  ;;  %v73_v14 = vld [vmem:[%s4111_s5 + $0x8] sm:$0xff]  ;;  %v74_v15 = vld [vmem:[%s4111_s5 + $0x10] sm:$0xff] }
 0x875   :  { %v620_v16 = vpop.permute.xlu1 %619 }
 0x876   :  { %625 = vst.msk [vmem:[#allocation2 + $0x8] sm:$0xff] %vm623_vm4, %v620_v16  ;;  %3140 = vmatprep.subr.bf16.mxu0 %v3139_v47  ;;  %3156 = vmatprep.subr.bf16.mxu1 %v3155_v10  ;;  %v75_v16 = vld [vmem:[%s4111_s5 + $0x18] sm:$0xff] }
 0x877   :  { %3142 = vmatpush3.bf16.msra.mxu0 %v3139_v47  ;;  %3158 = vmatpush3.bf16.msra.mxu1 %v3155_v10  ;;  %v3159_v47 = vpack.c.bf16 %v73_v14, %v72_v11 }
 0x879   :  { %v833_v12 = vpop.permute.xlu1 %832 }
 0x87c   :  { %v3382_v17 = vpop.eup %3381 }
 0x87d   :  { %v835_v18 = vpop.permute.xlu1 %834  ;;  %v948_v19 = vsel %vm299_vm3, %v3382_v17, 0.0  ;;  %v3384_v20 = vpop.eup %3383 }
 0x87e   :  { %840 = vst.msk [vmem:[#allocation2 + $0x8] sm:$0xff] %vm838_vm5, %v835_v18  ;;  %949 = vadd.xlane.f32.xlu0 %v948_v19  ;;  %v951_v21 = vsel %vm299_vm3, %v3384_v20, 0.0  ;;  %v77_v18 = vld [vmem:[%s4111_s5 + $0x28] sm:$0xff] }
 0x882   :  { %952 = vadd.xlane.f32.xlu0 %v951_v21 }
 0x898   :  { %617 = vrot.lane.b32.xlu0 %v3716_v13, %s3509_s12  ;;  %v64_v13 = vld [vmem:[%s4109_s3] sm:$0xff] }
 0x899   :  { %v3143_v34 = vpack.c.bf16 %v65_v33, %v64_v13 }
 0x89b   :  { %3144 = vmatprep.subr.bf16.mxu0 %v3143_v34 }
 0x90b   :  { %v950_v22 = vpop.xlane.xlu0 %949 }
 0x90c   :  { %3385 = vrcp.f32 %v950_v22 }
 0x90f   :  { %v953_v23 = vpop.xlane.xlu0 %952 }
 0x910   :  { %3387 = vrcp.f32 %v953_v23 }
 0x913   :  { %v618_v24 = vpop.permute.xlu0 %617 }
 0x914   :  { %624 = vst.msk [vmem:[#allocation2] sm:$0xff] %vm623_vm4, %v618_v24 }
 0x915   :  { %839 = vst.msk [vmem:[#allocation2] sm:$0xff] %vm838_vm5, %v833_v12  ;;  %v3163_v12 = vpack.c.bf16 %v75_v16, %v74_v15  ;;  %v2707_v15 = vld [vmem:[%s4108_s2 + $0x20] sm:$0xff] }
 0x916   :  { %v3386_v25 = vpop.eup %3385 }
 0x917   :  { %v956_v27 = vmul.f32 %v3386_v25, %v3382_v17  ;;  %v76_v17 = vld [vmem:[%s4111_s5 + $0x20] sm:$0xff] }
 0x918   :  { %v3167_v19 = vpack.c.bf16 %v77_v18, %v76_v17  ;;  %v2710_v17 = vld [vmem:[%s4108_s2 + $0x38] sm:$0xff] }
 0x919   :  { %2943 = vmatprep.mubr.msk.f32.mxu0 %vm299_vm3, %v956_v27  ;;  %v1173_v27 = vsub.s32 2, %v3619_v26 }
 0x91a   :  { %v3388_v31 = vpop.eup %3387 }
 0x91b   :  { %v957_v32 = vmul.f32 %v3388_v31, %v3384_v20  ;;  %v1179_v31 = vsub.s32 3, %v3619_v26 }
 0x91d   :  { %2944 = vmatmul.mubr.msk.f32.vlgmr.msra.gmra.mrb[6].mxu0 %vm299_vm3, %v957_v32  ;;  %v1174_v32 = vrot.slane %v3625_v29, %v1173_v27 }
 0x91e   :  { %3146 = vmatpush3.bf16.msra.mxu0 %v3143_v34  ;;  %v1180_v34 = vrot.slane %v3625_v29, %v1179_v31 }
 0x91f   :  { %3148 = vmatprep.subr.bf16.mxu0 %v3147_v46 }
 0x922   :  { %3150 = vmatpush3.bf16.msra.mxu0 %v3147_v46 }
 0x923   :  { %3160 = vmatprep.subr.bf16.mxu0 %v3159_v47 }
 0x9f0   :  { %v2945_v37 = vpop.f32.mrb[6].mxu0 }
 0x9f1   :  { %1049 = vrot.lane.b32.xlu1 %v2945_v37, %s3523_s9  ;;  %v1036_v44 = vpop.f32.mrb[7].mxu0 }
 0x9f2   :  { %1047 = vrot.lane.b32.xlu0 %v1036_v44, %s3523_s9 }
 0xa63   :  { %v1050_v38 = vpop.permute.xlu1 %1049 }
 0xa64   :  { %1055 = vst.msk [vmem:[#allocation2 + $0x8] sm:$0xff] %vm1053_vm6, %v1050_v38  ;;  %v1048_v39 = vpop.permute.xlu0 %1047 }
 0xa65   :  { %1054 = vst.msk [vmem:[#allocation2] sm:$0xff] %vm1053_vm6, %v1048_v39  ;;  %v78_v39 = vld [vmem:[%s4111_s5 + $0x30] sm:$0xff] }
 0xa6b   :  { %v1057_v42 = vld [vmem:[#allocation2 + $0x8] sm:$0xff] }
 0xa6c   :  { %v1056_v40 = vld [vmem:[#allocation2] sm:$0xff] }
 0xa6d   :  { %2954 = vmatprep.mubr.msk.f32.mxu0 %vm80_vm0, %v1056_v40  ;;  %v79_v40 = vld [vmem:[%s4111_s5 + $0x38] sm:$0xff] }
 0xa6e   :  { %2955 = vmatmul.mubr.msk.f32.vlgmr.msra.gmra.mrb[8].mxu0 %vm80_vm0, %v1057_v42  ;;  %v3171_v42 = vpack.c.bf16 %v79_v40, %v78_v39 }
 0xa6f   :  { %3162 = vmatpush3.bf16.msra.mxu0 %v3159_v47  ;;  %v2708_v47 = vld [vmem:[%s4108_s2 + $0x28] sm:$0xff] }
 0xa70   :  { %3164 = vmatprep.subr.bf16.mxu0 %v3163_v12  ;;  %v3175_v16 = vpack.c.bf16 %v2708_v47, %v2707_v15 }
 0xa72   :  { %3176 = vmatprep.subr.bf16.mxu1 %v3175_v16 }
 0xa73   :  { %3166 = vmatpush3.bf16.msra.mxu0 %v3163_v12  ;;  %v2709_v12 = vld [vmem:[%s4108_s2 + $0x30] sm:$0xff] }
 0xa74   :  { %3168 = vmatprep.subr.bf16.mxu0 %v3167_v19  ;;  %v3179_v18 = vpack.c.bf16 %v2710_v17, %v2709_v12 }
 0xa77   :  { %3170 = vmatpush3.bf16.msra.mxu0 %v3167_v19 }
 0xa78   :  { %3172 = vmatprep.subr.bf16.mxu0 %v3171_v42 }
 0xa7b   :  { %3174 = vmatpush3.bf16.msra.mxu0 %v3171_v42 }
 0xb41   :  { %v2956_v48 = vpop.f32.mrb[8].mxu0 }
 0xb42   :  { %v1140_v49 = vadd.f32 %v2956_v48, %v1061_v45  ;;  %v1134_v50 = vpop.f32.mrb[9].mxu0 }
 0xb43   :  { %v1135_v51 = vadd.f32 %v1134_v50, %v1061_v45  ;;  %v1185_v45 = vsub.s32 6, %v3619_v26 }
 0xb44   :  { %v3783_v52 = vadd.f32 %v1140_v49, %v3597_v1 }
 0xb45   :  { %v3786_v53 = vadd.f32 %v1135_v51, %v3595_v0  ;;  %v1186_v48 = vrot.slane %v3625_v29, %v1185_v45 }
 0xb46   :  { %v1148_v55 = vsel %vm80_vm0, %v3783_v52, 0.0 }
 0xb47   :  { %1149 = vadd.xlane.f32.xlu1 %v1148_v55  ;;  %v1145_v56 = vsel %vm80_vm0, %v3786_v53, 0.0 }
 0xb48   :  { %1146 = vadd.xlane.f32.xlu0 %v1145_v56 }
 0xbd4   :  { %v1150_v57 = vpop.xlane.xlu1 %1149 }
 0xbd5   :  { %v1152_v58 = vmul.f32 0.03125, %v1150_v57  ;;  %v1147_v59 = vpop.xlane.xlu0 %1146 }
 0xbd6   :  { %v1151_v61 = vmul.f32 0.03125, %v1147_v59 }
 0xbd7   :  { %v1154_v62 = vsub.f32 %v3783_v52, %v1152_v58  ;;  %v1272_v58 = vsub.s32 5, %v3619_v26 }
 0xbd8   :  { %v1153_v1 = vsub.f32 %v3786_v53, %v1151_v61 }
 0xbd9   :  { %v1156_v3 = vmul.f32 %v1154_v62, %v1154_v62  ;;  %v1273_v59 = vrot.slane %v3625_v29, %v1272_v58 }
 0xbda   :  { %v1155_v2 = vmul.f32 %v1153_v1, %v1153_v1 }
 0xbdb   :  { %v1160_v4 = vsel %vm80_vm0, %v1156_v3, 0.0 }
 0xbdc   :  { %v1157_v0 = vsel %vm80_vm0, %v1155_v2, 0.0 }
 0xbdd   :  { %1158 = vadd.xlane.f32.xlu0 %v1157_v0 }
 0xbe1   :  { %1161 = vadd.xlane.f32.xlu0 %v1160_v4 }
 0xc6a   :  { %v1159_v20 = vpop.xlane.xlu0 %1158 }
 0xc6b   :  { %v1163_v21 = vmul.f32 0.03125, %v1159_v20 }
 0xc6d   :  { %v1165_v22 = vadd.f32 1e-05, %v1163_v21 }
 0xc6e   :  { %v1162_v23 = vpop.xlane.xlu0 %1161 }
 0xc6f   :  { %3389 = vrsqrt.f32 %v1165_v22  ;;  %v1164_v24 = vmul.f32 0.03125, %v1162_v23 }
 0xc71   :  { %v1166_v25 = vadd.f32 1e-05, %v1164_v24 }
 0xc73   :  { %3391 = vrsqrt.f32 %v1166_v25  ;;  %v3881_v25 = vld [vmem:[%s4112_s6 + $0x8] sm:$0xff] }
 0xc79   :  { %v3390_v13 = vpop.eup %3389 }
 0xc7a   :  { %v1169_v33 = vmul.f32 %v3390_v13, %v1153_v1 }
 0xc7c   :  { %v1175_v35 = vmul.f32 %v1174_v32, %v1169_v33 }
 0xc7d   :  { %v3392_v36 = vpop.eup %3391 }
 0xc7e   :  { %v1170_v46 = vmul.f32 %v3392_v36, %v1154_v62  ;;  %v1181_v37 = vadd.f32 %v1180_v34, %v1175_v35 }
 0xc80   :  { %v1176_v44 = vmul.f32 %v1174_v32, %v1170_v46  ;;  %2965 = vmatprep.mubr.msk.f32.mxu1 %vm80_vm0, %v1181_v37  ;;  %v1413_v32 = vrot.slane %v3881_v25, %v110_v28  ;;  %v1425_v28 = vrot.slane %v3881_v25, %v122_v41 }
 0xc82   :  { %v1182_v38 = vadd.f32 %v1180_v34, %v1176_v44  ;;  %v1419_v34 = vrot.slane %v3881_v25, %v116_v30 }
 0xc84   :  { %2966 = vmatmul.mubr.msk.f32.vlgmr.msra.gmra.mrb[10].mxu1 %vm80_vm0, %v1182_v38 }
 0xc85   :  { %3178 = vmatpush3.bf16.msra.mxu1 %v3175_v16 }
 0xc86   :  { %3180 = vmatprep.subr.bf16.mxu1 %v3179_v18 }
 0xc89   :  { %3182 = vmatpush3.bf16.msra.mxu1 %v3179_v18 }
 0xd57   :  { %v2967_v49 = vpop.f32.mrb[10].mxu1 }
 0xd58   :  { %v1265_v50 = vadd.f32 %v2967_v49, %v1186_v48  ;;  %v1259_v51 = vpop.f32.mrb[11].mxu1 }
 0xd59   :  { %v1260_v55 = vadd.f32 %v1259_v51, %v1186_v48 }
 0xd5a   :  { %v1269_v57 = vmax.f32 %v1265_v50, 0.0 }
 0xd5b   :  { %v1268_v56 = vmax.f32 %v1260_v55, 0.0 }
 0xd5d   :  { %2984 = vmatprep.mubr.msk.f32.mxu0 %vm1274_vm7, %v1268_v56 }
 0xd5e   :  { %2985 = vmatmul.mubr.msk.f32.vlgmr.msra.gmra.mrb[10].mxu0 %vm1274_vm7, %v1269_v57 }
 0xe31   :  { %v2986_v61 = vpop.f32.mrb[10].mxu0 }
 0xe32   :  { %v1353_v62 = vadd.f32 %v2986_v61, %v1273_v59  ;;  %v1347_v1 = vpop.f32.mrb[11].mxu0 }
 0xe33   :  { %v1348_v2 = vadd.f32 %v1347_v1, %v1273_v59 }
 0xe34   :  { %v3853_v0 = vadd.f32 %v1353_v62, %v3783_v52 }
 0xe35   :  { %v3856_v3 = vadd.f32 %v1348_v2, %v3786_v53 }
 0xe36   :  { %v1387_v4 = vsel %vm80_vm0, %v3853_v0, 0.0 }
 0xe37   :  { %1388 = vadd.xlane.f32.xlu1 %v1387_v4  ;;  %v1384_v5 = vsel %vm80_vm0, %v3856_v3, 0.0 }
 0xe38   :  { %1385 = vadd.xlane.f32.xlu0 %v1384_v5 }
 0xec4   :  { %v1389_v6 = vpop.xlane.xlu1 %1388 }
 0xec5   :  { %v1391_v29 = vmul.f32 0.03125, %v1389_v6  ;;  %v1386_v7 = vpop.xlane.xlu0 %1385 }
 0xec6   :  { %v1390_v8 = vmul.f32 0.03125, %v1386_v7 }
 0xec7   :  { %v1393_v9 = vsub.f32 %v3853_v0, %v1391_v29 }
 0xec8   :  { %v1392_v52 = vsub.f32 %v3856_v3, %v1390_v8 }
 0xec9   :  { %v1395_v10 = vmul.f32 %v1393_v9, %v1393_v9 }
 0xeca   :  { %v1394_v11 = vmul.f32 %v1392_v52, %v1392_v52 }
 0xecb   :  { %v1399_v53 = vsel %vm80_vm0, %v1395_v10, 0.0 }
 0xecc   :  { %1400 = vadd.xlane.f32.xlu1 %v1399_v53  ;;  %v1396_v14 = vsel %vm80_vm0, %v1394_v11, 0.0 }
 0xecd   :  { %1397 = vadd.xlane.f32.xlu0 %v1396_v14 }
 0xf59   :  { %v1401_v19 = vpop.xlane.xlu1 %1400 }
 0xf5a   :  { %v1403_v20 = vmul.f32 0.03125, %v1401_v19  ;;  %v1398_v21 = vpop.xlane.xlu0 %1397 }
 0xf5b   :  { %v1402_v22 = vmul.f32 0.03125, %v1398_v21 }
 0xf5c   :  { %v1405_v23 = vadd.f32 1e-05, %v1403_v20 }
 0xf5d   :  { %v1404_v24 = vadd.f32 1e-05, %v1402_v22 }
 0xf5e   :  { %3393 = vrsqrt.f32 %v1405_v23 }
 0xf5f   :  { %3395 = vrsqrt.f32 %v1404_v24 }
 0xf68   :  { %v3394_v13 = vpop.eup %3393 }
 0xf69   :  { %v3396_v33 = vpop.eup %3395  ;;  %v1409_v35 = vmul.f32 %v3394_v13, %v1393_v9 }
 0xf6a   :  { %v1408_v36 = vmul.f32 %v3396_v33, %v1392_v52 }
 0xf6b   :  { %v1415_v46 = vmul.f32 %v1413_v32, %v1409_v35 }
 0xf6c   :  { %v1414_v37 = vmul.f32 %v1413_v32, %v1408_v36 }
 0xf6d   :  { %v1421_v44 = vadd.f32 %v1419_v34, %v1415_v46 }
 0xf6e   :  { %v1420_v38 = vadd.f32 %v1419_v34, %v1414_v37 }
 0xf70   :  { %2995 = vmatprep.mubr.msk.f32.mxu1 %vm80_vm0, %v1420_v38 }
 0xf71   :  { %2996 = vmatmul.mubr.msk.f32.vlgmr.msra.gmra.mrb[12].mxu1 %vm80_vm0, %v1421_v44 }
0x1044   :  { %v2997_v39 = vpop.f32.mrb[12].mxu1 }
0x1045   :  { %v3894_v40 = vadd.f32 %v2997_v39, %v1425_v28  ;;  %v1498_v42 = vpop.f32.mrb[13].mxu1 }
0x1046   :  { %v3896_v48 = vadd.f32 %v1498_v42, %v1425_v28 }
0x1048   :  { %3002 = vmatprep.mubr.msk.f32.mxu1 %vm211_vm1, %v3896_v48  ;;  %v3902_v30 = vpack.i.bf16 %v3894_v40, %v3896_v48 }
0x104a   :  { %3319 = vrot.lane.b32.xlu1 %v3902_v30, %s3511_s14  ;;  %3314 = vrot.lane.b32.xlu0 %v3902_v30, %s3512_s15 }
0x104e   :  { %1711 = vrot.lane.b32.xlu1 %v3896_v48, %s3513_s16 }
0x1052   :  { %1713 = vrot.lane.b32.xlu1 %v3894_v40, %s3513_s16 }
0x10bc   :  { %v3320_v41 = vpop.permute.xlu1 %3319  ;;  %v3315_v49 = vpop.permute.xlu0 %3314 }
0x10bd   :  { %v3322_v50 = vunpack.i.h.bf16 %v3320_v41  ;;  %v3321_v51 = vunpack.i.l.bf16 %v3320_v41  ;;  %v3317_v55 = vunpack.i.h.bf16 %v3315_v49  ;;  %v3316_v56 = vunpack.i.l.bf16 %v3315_v49 }
0x10bf   :  { %v3183_v57 = vpack.c.bf16 %v3317_v55, %v3316_v56  ;;  %v3193_v59 = vpack.c.bf16 %v3322_v50, %v3321_v51 }
0x10c0   :  { %v1712_v61 = vpop.permute.xlu1 %1711 }
0x10c1   :  { %3185 = vmatprep.subr.msk.bf16.mxu1 %vm3660_vm2, %v3183_v57 }
0x10c2   :  { %3188 = vmatpush3.bf16.xpose.msk.msra.mxu1 %vm3660_vm2, %v3183_v57 }
0x10c3   :  { %3195 = vmatprep.subr.msk.bf16.mxu1 %vm3660_vm2, %v3193_v59 }
0x10c4   :  { %v1714_v62 = vpop.permute.xlu1 %1713 }
0x10c9   :  { %3003 = vmatmul.mubr.msk.f32.vlgmr.msra.gmra.mrb[14].mxu1 %vm211_vm1, %v3894_v40 }
0x10ca   :  { %3198 = vmatpush3.bf16.xpose.msk.msra.mxu1 %vm3660_vm2, %v3193_v59  ;;  %3016 = vmatprep.mubr.msk.f32.mxu1 %vm211_vm1, %v1712_v61 }
0x10d1   :  { %3017 = vmatmul.mubr.msk.f32.vlgmr.msra.gmra.mrb[16].mxu1 %vm211_vm1, %v1714_v62 }
0x119c   :  { %v3004_v1 = vpop.f32.mrb[14].mxu1 }
0x119d   :  { %v1597_v2 = vmul.f32 0.35355338, %v3004_v1  ;;  %v1587_v4 = vpop.f32.mrb[15].mxu1 }
0x119e   :  { %v1596_v5 = vmul.f32 0.35355338, %v1587_v4 }
0x119f   :  { %v1599_v6 = vadd.f32 %v1597_v2, %v3676_v60 }
0x11a0   :  { %v1598_v29 = vadd.f32 %v1596_v5, %v3678_v63 }
0x11a1   :  { %v1603_v7 = vsel %vm299_vm3, %v1599_v6, -inf }
0x11a2   :  { %1604 = vmax.xlane.f32.xlu1 %v1603_v7  ;;  %v1600_v8 = vsel %vm299_vm3, %v1598_v29, -inf }
0x11a3   :  { %1601 = vmax.xlane.f32.xlu0 %v1600_v8 }
0x11a4   :  { %v3018_v9 = vpop.f32.mrb[16].mxu1 }
0x11a5   :  { %v1793_v52 = vpop.f32.mrb[17].mxu1  ;;  %v1803_v10 = vmul.f32 0.35355338, %v3018_v9 }
0x11a6   :  { %v1802_v11 = vmul.f32 0.35355338, %v1793_v52 }
0x11a7   :  { %v1805_v15 = vadd.f32 %v1803_v10, %v3676_v60 }
0x11a8   :  { %v1804_v53 = vadd.f32 %v1802_v11, %v3678_v63 }
0x11a9   :  { %v1809_v47 = vsel %vm299_vm3, %v1805_v15, -inf }
0x11aa   :  { %v1806_v14 = vsel %vm299_vm3, %v1804_v53, -inf }
0x11ab   :  { %1807 = vmax.xlane.f32.xlu0 %v1806_v14 }
0x11af   :  { %1810 = vmax.xlane.f32.xlu0 %v1809_v47 }
0x122f   :  { %v1605_v16 = vpop.xlane.xlu1 %1604 }
0x1230   :  { %v1607_v12 = vsub.f32 %v1599_v6, %v1605_v16  ;;  %v1602_v17 = vpop.xlane.xlu0 %1601 }
0x1231   :  { %v1606_v18 = vsub.f32 %v1598_v29, %v1602_v17 }
0x1232   :  { %v1610_v19 = vmul.f32 1.442695, %v1607_v12 }
0x1233   :  { %v1608_v20 = vmul.f32 1.442695, %v1606_v18  ;;  %v3433_v18 = vld [vmem:[#allocation6 + $0x8] sm:$0xff] }
0x1234   :  { %3397 = vpow2.f32 %v1610_v19 }
0x1235   :  { %3399 = vpow2.f32 %v1608_v20  ;;  %v3434_v20 = vld [vmem:[#allocation6] sm:$0xff] }
0x1238   :  { %v1808_v21 = vpop.xlane.xlu0 %1807 }
0x1239   :  { %v1812_v22 = vsub.f32 %v1804_v53, %v1808_v21 }
0x123b   :  { %v1814_v23 = vmul.f32 1.442695, %v1812_v22 }
0x123c   :  { %v1811_v63 = vpop.xlane.xlu0 %1810 }
0x123d   :  { %3401 = vpow2.f32 %v1814_v23  ;;  %v1813_v24 = vsub.f32 %v1805_v15, %v1811_v63 }
0x123e   :  { %v3398_v32 = vpop.eup %3397 }
0x123f   :  { %v3400_v60 = vpop.eup %3399  ;;  %v1816_v13 = vmul.f32 1.442695, %v1813_v24  ;;  %v1615_v33 = vsel %vm299_vm3, %v3398_v32, 0.0 }
0x1240   :  { %1616 = vadd.xlane.f32.xlu1 %v1615_v33  ;;  %v1612_v34 = vsel %vm299_vm3, %v3400_v60, 0.0 }
0x1241   :  { %3403 = vpow2.f32 %v1816_v13  ;;  %1613 = vadd.xlane.f32.xlu0 %v1612_v34 }
0x1247   :  { %v3402_v35 = vpop.eup %3401 }
0x1248   :  { %v1818_v36 = vsel %vm299_vm3, %v3402_v35, 0.0 }
0x1249   :  { %1819 = vadd.xlane.f32.xlu0 %v1818_v36 }
0x124b   :  { %v3404_v46 = vpop.eup %3403 }
0x124c   :  { %v1821_v37 = vsel %vm299_vm3, %v3404_v46, 0.0 }
0x124d   :  { %1822 = vadd.xlane.f32.xlu1 %v1821_v37 }
0x125e   :  { %3329 = vrot.lane.b32.xlu1 %v3902_v30, %s3514_s17 }
0x125f   :  { %3324 = vrot.lane.b32.xlu0 %v3902_v30, %s3515_s18 }
0x1262   :  { %3334 = vrot.lane.b32.xlu1 %v3902_v30, %s3516_s19 }
0x1263   :  { %1927 = vrot.lane.b32.xlu0 %v3894_v40, %s3517_s20 }
0x1266   :  { %1925 = vrot.lane.b32.xlu1 %v3896_v48, %s3517_s20 }
0x12cd   :  { %v1617_v38 = vpop.xlane.xlu1 %1616 }
0x12ce   :  { %v1614_v44 = vpop.xlane.xlu0 %1613 }
0x12cf   :  { %3405 = vrcp.f32 %v1614_v44 }
0x12d0   :  { %3407 = vrcp.f32 %v1617_v38 }
0x12d6   :  { %v1820_v28 = vpop.xlane.xlu0 %1819 }
0x12d7   :  { %3409 = vrcp.f32 %v1820_v28 }
0x12d9   :  { %v3406_v39 = vpop.eup %3405 }
0x12da   :  { %v1823_v42 = vpop.xlane.xlu1 %1822  ;;  %v3325_v41 = vpop.permute.xlu0 %3324  ;;  %v1620_v49 = vmul.f32 %v3406_v39, %v3400_v60 }
0x12db   :  { %3411 = vrcp.f32 %v1823_v42  ;;  %v3327_v50 = vunpack.i.h.bf16 %v3325_v41  ;;  %v3326_v51 = vunpack.i.l.bf16 %v3325_v41  ;;  %v3408_v56 = vpop.eup %3407 }
0x12dc   :  { %3009 = vmatprep.mubr.msk.f32.mxu0 %vm299_vm3, %v1620_v49  ;;  %v1621_v1 = vmul.f32 %v3408_v56, %v3398_v32 }
0x12dd   :  { %v3189_v55 = vpack.c.bf16 %v3327_v50, %v3326_v51 }
0x12de   :  { %v3330_v57 = vpop.permute.xlu1 %3329  ;;  %v1928_v10 = vpop.permute.xlu0 %1927 }
0x12df   :  { %v3332_v59 = vunpack.i.h.bf16 %v3330_v57  ;;  %v3331_v61 = vunpack.i.l.bf16 %v3330_v57  ;;  %3190 = vmatprep.subr.bf16.mxu0 %v3189_v55 }
0x12e0   :  { %3192 = vmatpush3.bf16.msra.mxu0 %v3189_v55 }
0x12e1   :  { %v3410_v62 = vpop.eup %3409  ;;  %v3199_v2 = vpack.c.bf16 %v3332_v59, %v3331_v61 }
0x12e2   :  { %v3335_v4 = vpop.permute.xlu1 %3334  ;;  %v1826_v5 = vmul.f32 %v3410_v62, %v3402_v35 }
0x12e3   :  { %v3337_v6 = vunpack.i.h.bf16 %v3335_v4  ;;  %v3336_v29 = vunpack.i.l.bf16 %v3335_v4  ;;  %3010 = vmatmul.mubr.msk.f32.vlgmr.msra.gmra.mrb[12].mxu0 %vm299_vm3, %v1621_v1  ;;  %3200 = vmatprep.subr.bf16.mxu0 %v3199_v2 }
0x12e4   :  { %3202 = vmatpush3.bf16.msra.mxu0 %v3199_v2  ;;  %3023 = vmatprep.mubr.msk.f32.mxu0 %vm299_vm3, %v1826_v5 }
0x12e5   :  { %v3412_v7 = vpop.eup %3411  ;;  %v3203_v8 = vpack.c.bf16 %v3337_v6, %v3336_v29 }
0x12e6   :  { %v1827_v9 = vmul.f32 %v3412_v7, %v3404_v46  ;;  %v1926_v52 = vpop.permute.xlu1 %1925 }
0x12e7   :  { %3205 = vmatprep.subr.msk.bf16.mxu0 %vm3660_vm2, %v3203_v8 }
0x12e8   :  { %3024 = vmatmul.mubr.msk.f32.vlgmr.msra.gmra.mrb[14].mxu0 %vm299_vm3, %v1827_v9 }
0x12e9   :  { %3030 = vmatprep.mubr.msk.f32.mxu0 %vm211_vm1, %v1926_v52 }
0x12ed   :  { %3208 = vmatpush3.bf16.xpose.msk.msra.mxu0 %vm3660_vm2, %v3203_v8 }
0x12f4   :  { %3031 = vmatmul.mubr.msk.f32.vlgmr.msra.gmra.mrb[16].mxu0 %vm211_vm1, %v1928_v10 }
0x13b6   :  { %v3011_v11 = vpop.f32.mrb[12].mxu0 }
0x13b7   :  { %1710 = vst.msk [vmem:[#allocation2 + $0x8] sm:$0xff] %vm211_vm1, %v3011_v11  ;;  %v1700_v53 = vpop.f32.mrb[13].mxu0 }
0x13b8   :  { %1709 = vst.msk [vmem:[#allocation2] sm:$0xff] %vm211_vm1, %v1700_v53 }
0x13bb   :  { %v3958_v14 = vpop.f32.mrb[14].mxu0 }
0x13bc   :  { %v3960_v15 = vpop.f32.mrb[15].mxu0 }
0x13c7   :  { %v3032_v47 = vpop.f32.mrb[16].mxu0 }
0x13c8   :  { %v2017_v16 = vmul.f32 0.35355338, %v3032_v47  ;;  %v2007_v12 = vpop.f32.mrb[17].mxu0 }
0x13c9   :  { %v2016_v17 = vmul.f32 0.35355338, %v2007_v12 }
0x13ca   :  { %v2019_v19 = vadd.f32 %v3433_v18, %v2017_v16 }
0x13cb   :  { %v2018_v21 = vadd.f32 %v3434_v20, %v2016_v17 }
0x13cc   :  { %v2023_v22 = vsel %vm299_vm3, %v2019_v19, -inf }
0x13cd   :  { %2024 = vmax.xlane.f32.xlu0 %v2023_v22  ;;  %v2020_v23 = vsel %vm299_vm3, %v2018_v21, -inf }
0x13ce   :  { %2021 = vmax.xlane.f32.xlu1 %v2020_v23 }
0x13df   :  { %3339 = vrot.lane.b32.xlu1 %v3902_v30, %s3518_s21 }
0x13e3   :  { %2139 = vrot.lane.b32.xlu1 %v3896_v48, %s3519_s22 }
0x13e7   :  { %2141 = vrot.lane.b32.xlu1 %v3894_v40, %s3519_s22 }
0x145a   :  { %v2025_v63 = vpop.xlane.xlu0 %2024 }
0x145b   :  { %v2027_v24 = vsub.f32 %v2019_v19, %v2025_v63  ;;  %v2022_v32 = vpop.xlane.xlu1 %2021 }
0x145c   :  { %v2026_v60 = vsub.f32 %v2018_v21, %v2022_v32 }
0x145d   :  { %v2030_v13 = vmul.f32 1.442695, %v2027_v24 }
0x145e   :  { %v2028_v33 = vmul.f32 1.442695, %v2026_v60 }
0x145f   :  { %3413 = vpow2.f32 %v2030_v13  ;;  %v3340_v34 = vpop.permute.xlu1 %3339 }
0x1460   :  { %v3342_v35 = vunpack.i.h.bf16 %v3340_v34  ;;  %v3341_v36 = vunpack.i.l.bf16 %v3340_v34  ;;  %3415 = vpow2.f32 %v2028_v33  ;;  %v2712_v34 = vld [vmem:[%s4109_s3 + $0x28] sm:$0xff] }
0x1462   :  { %v3209_v46 = vpack.c.bf16 %v3342_v35, %v3341_v36  ;;  %v2713_v36 = vld [vmem:[%s4109_s3 + $0x30] sm:$0xff] }
0x1463   :  { %v2140_v57 = vpop.permute.xlu1 %2139 }
0x1464   :  { %3210 = vmatprep.subr.bf16.mxu1 %v3209_v46 }
0x1465   :  { %3212 = vmatpush3.bf16.msra.mxu1 %v3209_v46  ;;  %v2714_v46 = vld [vmem:[%s4109_s3 + $0x38] sm:$0xff] }
0x1467   :  { %v2142_v59 = vpop.permute.xlu1 %2141 }
0x1469   :  { %v3414_v37 = vpop.eup %3413 }
0x146a   :  { %v2035_v48 = vsel %vm299_vm3, %v3414_v37, 0.0  ;;  %v3416_v44 = vpop.eup %3415 }
0x146b   :  { %2036 = vadd.xlane.f32.xlu0 %v2035_v48  ;;  %v2032_v40 = vsel %vm299_vm3, %v3416_v44, 0.0 }
0x146f   :  { %2033 = vadd.xlane.f32.xlu0 %v2032_v40 }
0x1485   :  { %3344 = vrot.lane.b32.xlu0 %v3902_v30, %s3520_s23 }
0x14f8   :  { %v2037_v38 = vpop.xlane.xlu0 %2036 }
0x14f9   :  { %3417 = vrcp.f32 %v2037_v38 }
0x14fc   :  { %v2034_v28 = vpop.xlane.xlu0 %2033 }
0x14fd   :  { %3419 = vrcp.f32 %v2034_v28 }
0x1500   :  { %v3345_v39 = vpop.permute.xlu0 %3344 }
0x1501   :  { %v3347_v42 = vunpack.i.h.bf16 %v3345_v39  ;;  %v3346_v41 = vunpack.i.l.bf16 %v3345_v39 }
0x1503   :  { %v3213_v49 = vpack.c.bf16 %v3347_v42, %v3346_v41  ;;  %v3418_v50 = vpop.eup %3417  ;;  %v2358_v42 = vrot.slane %v3881_v25, %v1060_v43 }
0x1504   :  { %v2041_v56 = vmul.f32 %v3418_v50, %v3414_v37  ;;  %v3227_v37 = vpack.c.bf16 %v2714_v46, %v2713_v36  ;;  %v2726_v46 = vld [vmem:[%s4111_s5 + $0x78] sm:$0xff] }
0x1505   :  { %3215 = vmatprep.subr.msk.bf16.mxu1 %vm3660_vm2, %v3213_v49 }
0x1507   :  { %v3420_v51 = vpop.eup %3419 }
0x1508   :  { %v2040_v55 = vmul.f32 %v3420_v51, %v3416_v44 }
0x150a   :  { %3037 = vmatprep.mubr.msk.f32.mxu1 %vm299_vm3, %v2040_v55 }
0x150b   :  { %3038 = vmatmul.mubr.msk.f32.vlgmr.msra.gmra.mrb[18].mxu1 %vm299_vm3, %v2041_v56 }
0x150c   :  { %3218 = vmatpush3.bf16.xpose.msk.msra.mxu1 %vm3660_vm2, %v3213_v49  ;;  %3044 = vmatprep.mubr.msk.f32.mxu1 %vm211_vm1, %v2140_v57 }
0x1513   :  { %3045 = vmatmul.mubr.msk.f32.vlgmr.msra.gmra.mrb[20].mxu1 %vm211_vm1, %v2142_v59 }
0x15de   :  { %v3039_v61 = vpop.f32.mrb[18].mxu1 }
0x15df   :  { %v2120_v62 = vpop.f32.mrb[19].mxu1 }
0x15e6   :  { %v3046_v1 = vpop.f32.mrb[20].mxu1 }
0x15e7   :  { %v2231_v2 = vmul.f32 0.35355338, %v3046_v1  ;;  %v2221_v4 = vpop.f32.mrb[21].mxu1 }
0x15e8   :  { %v2230_v5 = vmul.f32 0.35355338, %v2221_v4 }
0x15e9   :  { %v2233_v6 = vadd.f32 %v3433_v18, %v2231_v2 }
0x15ea   :  { %v2232_v29 = vadd.f32 %v3434_v20, %v2230_v5 }
0x15eb   :  { %v2237_v7 = vsel %vm299_vm3, %v2233_v6, -inf }
0x15ec   :  { %2238 = vmax.xlane.f32.xlu0 %v2237_v7  ;;  %v2234_v8 = vsel %vm299_vm3, %v2232_v29, -inf  ;;  %v2716_v7 = vld [vmem:[%s4110_s4 + $0x28] sm:$0xff] }
0x15ed   :  { %2235 = vmax.xlane.f32.xlu1 %v2234_v8 }
0x15fe   :  { %3349 = vrot.lane.b32.xlu1 %v3902_v30, %s3521_s24 }
0x1602   :  { %1919 = vrot.lane.b32.xlu1 %v3958_v14, %s3509_s12 }
0x1606   :  { %2131 = vrot.lane.b32.xlu1 %v2120_v62, %s3522_s0 }
0x160a   :  { %2133 = vrot.lane.b32.xlu1 %v3039_v61, %s3522_s0 }
0x1679   :  { %v2239_v54 = vpop.xlane.xlu0 %2238 }
0x167a   :  { %v2241_v9 = vsub.f32 %v2233_v6, %v2239_v54  ;;  %v2236_v52 = vpop.xlane.xlu1 %2235  ;;  %v2717_v54 = vld [vmem:[%s4110_s4 + $0x30] sm:$0xff] }
0x167b   :  { %v2240_v10 = vsub.f32 %v2232_v29, %v2236_v52  ;;  %v2715_v29 = vld [vmem:[%s4110_s4 + $0x20] sm:$0xff] }
0x167c   :  { %v2244_v11 = vmul.f32 1.442695, %v2241_v9  ;;  %v3231_v8 = vpack.c.bf16 %v2716_v7, %v2715_v29  ;;  %v2718_v9 = vld [vmem:[%s4110_s4 + $0x38] sm:$0xff] }
0x167d   :  { %v2242_v53 = vmul.f32 1.442695, %v2240_v10  ;;  %v3235_v52 = vpack.c.bf16 %v2718_v9, %v2717_v54  ;;  %v2719_v10 = vld [vmem:[%s4111_s5 + $0x40] sm:$0xff] }
0x167e   :  { %v3350_v47 = vpop.permute.xlu1 %3349  ;;  %3232 = vmatprep.subr.bf16.mxu1 %v3231_v8 }
0x167f   :  { %3421 = vpow2.f32 %v2242_v53  ;;  %v3352_v16 = vunpack.i.h.bf16 %v3350_v47  ;;  %v3351_v12 = vunpack.i.l.bf16 %v3350_v47  ;;  %3234 = vmatpush3.bf16.msra.mxu1 %v3231_v8  ;;  %v2721_v53 = vld [vmem:[%s4111_s5 + $0x50] sm:$0xff] }
0x1680   :  { %3423 = vpow2.f32 %v2244_v11  ;;  %3236 = vmatprep.subr.bf16.mxu1 %v3235_v52  ;;  %v2720_v11 = vld [vmem:[%s4111_s5 + $0x48] sm:$0xff] }
0x1681   :  { %v3219_v17 = vpack.c.bf16 %v3352_v16, %v3351_v12  ;;  %v3239_v47 = vpack.c.bf16 %v2720_v11, %v2719_v10  ;;  %v2722_v16 = vld [vmem:[%s4111_s5 + $0x58] sm:$0xff] }
0x1682   :  { %v1920_v30 = vpop.permute.xlu1 %1919  ;;  %v3243_v12 = vpack.c.bf16 %v2722_v16, %v2721_v53 }
0x1683   :  { %1924 = vst.msk [vmem:[#allocation2 + $0x8] sm:$0xff] %vm623_vm4, %v1920_v30  ;;  %3220 = vmatprep.subr.bf16.mxu0 %v3219_v17  ;;  %3238 = vmatpush3.bf16.msra.mxu1 %v3235_v52  ;;  %v2724_v30 = vld [vmem:[%s4111_s5 + $0x68] sm:$0xff] }
0x1684   :  { %3222 = vmatpush3.bf16.msra.mxu0 %v3219_v17  ;;  %v2723_v17 = vld [vmem:[%s4111_s5 + $0x60] sm:$0xff] }
0x1686   :  { %v2132_v14 = vpop.permute.xlu1 %2131 }
0x1689   :  { %v3422_v18 = vpop.eup %3421 }
0x168a   :  { %v2134_v19 = vpop.permute.xlu1 %2133  ;;  %v2246_v20 = vsel %vm299_vm3, %v3422_v18, 0.0  ;;  %v3424_v21 = vpop.eup %3423 }
0x168b   :  { %2138 = vst.msk [vmem:[#allocation2 + $0x8] sm:$0xff] %vm838_vm5, %v2134_v19  ;;  %2247 = vadd.xlane.f32.xlu0 %v2246_v20  ;;  %v2249_v22 = vsel %vm299_vm3, %v3424_v21, 0.0 }
0x168f   :  { %2250 = vadd.xlane.f32.xlu0 %v2249_v22 }
0x16a5   :  { %1917 = vrot.lane.b32.xlu0 %v3960_v15, %s3509_s12  ;;  %v2711_v15 = vld [vmem:[%s4109_s3 + $0x20] sm:$0xff] }
0x16a6   :  { %v3223_v35 = vpack.c.bf16 %v2712_v34, %v2711_v15 }
0x16a8   :  { %3224 = vmatprep.subr.bf16.mxu0 %v3223_v35 }
0x1718   :  { %v2248_v23 = vpop.xlane.xlu0 %2247 }
0x1719   :  { %3425 = vrcp.f32 %v2248_v23 }
0x171c   :  { %v2251_v63 = vpop.xlane.xlu0 %2250 }
0x171d   :  { %3427 = vrcp.f32 %v2251_v63  ;;  %v2471_v63 = vrot.slane %v3881_v25, %v1173_v27  ;;  %v2725_v27 = vld [vmem:[%s4111_s5 + $0x70] sm:$0xff]  ;;  %s3524_s5 = smov [#allocation8]  }
0x171e   :  { %s2661_s17 = sshll.u32 %s3524_s5, 4  ;;  %s2662_s17 = int_to_ptr.vmem [resolvable:$true] %s2661_s17 }
0x171f   :  { %s3479_s18 = scalar_lea.vmem %s2662_s17, 256  ;;  %p3484_p3 = scmp.lt.s32.totalorder %s2662_s17, %s2662_s17 }
0x1720   :  { %v1918_v24 = vpop.permute.xlu0 %1917  ;;  %p3480_p2 = scmp.ne.s32.totalorder %s2662_s17, %s3479_s18  ;;  %p3485_p4 = scmp.lt.s32.totalorder %s3479_s18, %s3479_s18 }
0x1721   :  { %1923 = vst.msk [vmem:[#allocation2] sm:$0xff] %vm623_vm4, %v1918_v24 }
0x1722   :  { %2137 = vst.msk [vmem:[#allocation2] sm:$0xff] %vm838_vm5, %v2132_v14  ;;  %v3247_v14 = vpack.c.bf16 %v2724_v30, %v2723_v17  ;;  %p3486_p5 = por %p3485_p4, %p3484_p3 }
0x1723   :  { %v3426_v32 = vpop.eup %3425 }
0x1724   :  { %v2254_v60 = vmul.f32 %v3426_v32, %v3422_v18  ;;  %p3487_p6 = pnand %p3486_p5, %p3480_p2 }
0x1726   :  { %3051 = vmatprep.mubr.msk.f32.mxu0 %vm299_vm3, %v2254_v60  ;;  %v2477_v60 = vrot.slane %v3881_v25, %v1179_v31  ;;  %v2483_v31 = vrot.slane %v3881_v25, %v1185_v45 }
0x1727   :  { %v3428_v13 = vpop.eup %3427 }
0x1728   :  { %v2255_v33 = vmul.f32 %v3428_v13, %v3424_v21 }
0x172a   :  { %3052 = vmatmul.mubr.msk.f32.vlgmr.msra.gmra.mrb[18].mxu0 %vm299_vm3, %v2255_v33 }
0x172b   :  { %3226 = vmatpush3.bf16.msra.mxu0 %v3223_v35 }
0x172c   :  { %3228 = vmatprep.subr.bf16.mxu0 %v3227_v37 }
0x172f   :  { %3230 = vmatpush3.bf16.msra.mxu0 %v3227_v37  ;;  %v3251_v37 = vpack.c.bf16 %v2726_v46, %v2725_v27 }
0x1730   :  { %3240 = vmatprep.subr.bf16.mxu0 %v3239_v47 }
0x17fd   :  { %v3053_v48 = vpop.f32.mrb[18].mxu0 }
0x17fe   :  { %2347 = vrot.lane.b32.xlu1 %v3053_v48, %s3523_s9  ;;  %v2334_v44 = vpop.f32.mrb[19].mxu0 }
0x17ff   :  { %2345 = vrot.lane.b32.xlu0 %v2334_v44, %s3523_s9 }
0x1870   :  { %v2348_v40 = vpop.permute.xlu1 %2347 }
0x1871   :  { %2352 = vst.msk [vmem:[#allocation2 + $0x8] sm:$0xff] %vm1053_vm6, %v2348_v40  ;;  %v2346_v38 = vpop.permute.xlu0 %2345 }
0x1872   :  { %2351 = vst.msk [vmem:[#allocation2] sm:$0xff] %vm1053_vm6, %v2346_v38 }
0x1878   :  { %v2354_v39 = vld [vmem:[#allocation2 + $0x8] sm:$0xff] }
0x1879   :  { %v2353_v28 = vld [vmem:[#allocation2] sm:$0xff] }
0x187a   :  { %3062 = vmatprep.mubr.msk.f32.mxu0 %vm80_vm0, %v2353_v28 }
0x187b   :  { %3063 = vmatmul.mubr.msk.f32.vlgmr.msra.gmra.mrb[20].mxu0 %vm80_vm0, %v2354_v39 }
0x187c   :  { %3242 = vmatpush3.bf16.msra.mxu0 %v3239_v47 }
0x187d   :  { %3244 = vmatprep.subr.bf16.mxu0 %v3243_v12 }
0x1880   :  { %3246 = vmatpush3.bf16.msra.mxu0 %v3243_v12 }
0x1881   :  { %3248 = vmatprep.subr.bf16.mxu0 %v3247_v14 }
0x1884   :  { %3250 = vmatpush3.bf16.msra.mxu0 %v3247_v14 }
0x1885   :  { %3252 = vmatprep.subr.bf16.mxu0 %v3251_v37 }
0x1888   :  { %3254 = vmatpush3.bf16.msra.mxu0 %v3251_v37 }
0x194e   :  { %v3064_v41 = vpop.f32.mrb[20].mxu0 }
0x194f   :  { %v2437_v49 = vadd.f32 %v3064_v41, %v2358_v42  ;;  %v2431_v50 = vpop.f32.mrb[21].mxu0 }
0x1950   :  { %v2432_v51 = vadd.f32 %v2431_v50, %v2358_v42  ;;  %v2570_v42 = vrot.slane %v3881_v25, %v1272_v58 }
0x1951   :  { %v4022_v55 = vadd.f32 %v2437_v49, %v3853_v0 }
0x1952   :  { %v4025_v56 = vadd.f32 %v2432_v51, %v3856_v3 }
0x1953   :  { %v2445_v57 = vsel %vm80_vm0, %v4022_v55, 0.0 }
0x1954   :  { %2446 = vadd.xlane.f32.xlu1 %v2445_v57  ;;  %v2442_v59 = vsel %vm80_vm0, %v4025_v56, 0.0 }
0x1955   :  { %2443 = vadd.xlane.f32.xlu0 %v2442_v59 }
0x19e1   :  { %v2447_v61 = vpop.xlane.xlu1 %2446 }
0x19e2   :  { %v2449_v43 = vmul.f32 0.03125, %v2447_v61  ;;  %v2444_v62 = vpop.xlane.xlu0 %2443 }
0x19e3   :  { %v2448_v1 = vmul.f32 0.03125, %v2444_v62 }
0x19e4   :  { %v2451_v2 = vsub.f32 %v4022_v55, %v2449_v43 }
0x19e5   :  { %v2450_v0 = vsub.f32 %v4025_v56, %v2448_v1 }
0x19e6   :  { %v2453_v5 = vmul.f32 %v2451_v2, %v2451_v2 }
0x19e7   :  { %v2452_v4 = vmul.f32 %v2450_v0, %v2450_v0 }
0x19e8   :  { %v2457_v6 = vsel %vm80_vm0, %v2453_v5, 0.0 }
0x19e9   :  { %v2454_v3 = vsel %vm80_vm0, %v2452_v4, 0.0 }
0x19ea   :  { %2455 = vadd.xlane.f32.xlu0 %v2454_v3 }
0x19ee   :  { %2458 = vadd.xlane.f32.xlu0 %v2457_v6 }
0x1a77   :  { %v2456_v18 = vpop.xlane.xlu0 %2455 }
0x1a78   :  { %v2460_v19 = vmul.f32 0.03125, %v2456_v18 }
0x1a7a   :  { %v2462_v20 = vadd.f32 1e-05, %v2460_v19 }
0x1a7b   :  { %v2459_v21 = vpop.xlane.xlu0 %2458 }
0x1a7c   :  { %3429 = vrsqrt.f32 %v2462_v20  ;;  %v2461_v22 = vmul.f32 0.03125, %v2459_v21 }
0x1a7e   :  { %v2463_v23 = vadd.f32 1e-05, %v2461_v22 }
0x1a80   :  { %3431 = vrsqrt.f32 %v2463_v23 }
0x1a86   :  { %v3430_v24 = vpop.eup %3429 }
0x1a87   :  { %v2466_v32 = vmul.f32 %v3430_v24, %v2450_v0 }
0x1a89   :  { %v2472_v13 = vmul.f32 %v2471_v63, %v2466_v32 }
0x1a8a   :  { %v3432_v33 = vpop.eup %3431 }
0x1a8b   :  { %v2467_v15 = vmul.f32 %v3432_v33, %v2451_v2  ;;  %v2478_v34 = vadd.f32 %v2477_v60, %v2472_v13 }
0x1a8d   :  { %v2473_v35 = vmul.f32 %v2471_v63, %v2467_v15  ;;  %3073 = vmatprep.mubr.msk.f32.mxu1 %vm80_vm0, %v2478_v34 }
0x1a8f   :  { %v2479_v36 = vadd.f32 %v2477_v60, %v2473_v35 }
0x1a91   :  { %3074 = vmatmul.mubr.msk.f32.vlgmr.msra.gmra.mrb[22].mxu1 %vm80_vm0, %v2479_v36 }
0x1b64   :  { %v3075_v48 = vpop.f32.mrb[22].mxu1 }
0x1b65   :  { %v2562_v44 = vadd.f32 %v3075_v48, %v2483_v31  ;;  %v2556_v40 = vpop.f32.mrb[23].mxu1 }
0x1b66   :  { %v2557_v38 = vadd.f32 %v2556_v40, %v2483_v31 }
0x1b67   :  { %v2566_v39 = vmax.f32 %v2562_v44, 0.0 }
0x1b68   :  { %v2565_v28 = vmax.f32 %v2557_v38, 0.0 }
0x1b6a   :  { %3092 = vmatprep.mubr.msk.f32.mxu0 %vm1274_vm7, %v2565_v28 }
0x1b6b   :  { %3093 = vmatmul.mubr.msk.f32.vlgmr.msra.gmra.mrb[22].mxu0 %vm1274_vm7, %v2566_v39 }
0x1c3e   :  { %v3094_v41 = vpop.f32.mrb[22].mxu0 }
0x1c3f   :  { %v2649_v49 = vadd.f32 %v3094_v41, %v2570_v42  ;;  %v2643_v50 = vpop.f32.mrb[23].mxu0 }
0x1c40   :  { %v2644_v45 = vadd.f32 %v2643_v50, %v2570_v42 }
0x1c41   :  { %v2653_v51 = vadd.f32 %v2649_v49, %v4022_v55 }
0x1c42   :  { %v2652_v57 = vadd.f32 %v2644_v45, %v4025_v56 }
0x1c43   :  { %2655 = vst.msk [vmem:[#allocation8 + $0x8] sm:$0xff] %vm80_vm0, %v2653_v51 }
0x1c44   :  { %2654 = vst.msk [vmem:[#allocation8] sm:$0xff] %vm80_vm0, %v2652_v57 }
0x1c45   :  { %3490 = shalt.err (!%p3487_p6)
}
0x1c46   :  { %s3491_s20 = scalar_lea.hbm %s4113_s7, 256 }
0x1c47   :  { %p3492_p7 = scmp.ne.s32.totalorder %s4113_s7, %s3491_s20  ;;  %p3495_p8 = scmp.lt.u32.totalorder %s3491_s20, %s4113_s7 }
0x1c49   :  { %p3497_p9 = pnand %p3495_p8, %p3492_p7 }
0x1c4b   :  { %3500 = shalt.err (!%p3497_p9)
}
0x1c4c   :  { %2667 = dma.vmem_to_hbm [thread:$0]  %s2662_s17, 256, %s4113_s7, [#allocation5], %s3508_s11, %s3508_s11, %s3509_s12  }
0x1c4d   :  { %3505 = dma.done.wait [#allocation5], 256  }
0x1c4e   :  { %3506 = vsyncadd [#allocation5], 4294967040 }
0x1c4f   :  { %2671 = vsyncpa [#allocation4], 1 }
0x1c50   :  { %2672 = vsyncpa [#allocation7], 1 }
0x1c51   :  { %2673 = vsyncpa [#allocation5], 1 }

</bundles_post_ra>
